<compile_context>
chip_gen: v5e
topology: v5e:2x2
jax: 0.10.0
libtpu: 0.0.40
codegen_flags: <defaults>
</compile_context>

<pallas_src>
import math
from functools import partial
from typing import NamedTuple

import numpy as np
import jax
import jax.numpy as jnp
from jax.experimental import pallas as pl
from jax.experimental.pallas import tpu as pltpu

# ----------------------------- small config ---------------------------------
TOKENS_PER_BLOCK = 4          # 3 obs tokens + 1 act token per block
MAX_BLOCKS = 2
MAX_TOKENS = TOKENS_PER_BLOCK * MAX_BLOCKS   # 8
EMBED_DIM = 32
NUM_HEADS = 2
NUM_LAYERS = 2
OBS_VOCAB = 16
ACT_VOCAB = 4
BATCH = 2
LN_EPS = 1e-5

LANES = 128                                   # blob / output lane width
EMB_TABLE_ROWS = 32                           # 16 obs + 4 act + 8 pos -> pad 32
HEAD_LANES = LANES - EMBED_DIM                # 96 lanes for the fused head out

# block masks exactly as in WorldModel.__init__
ACT_PATTERN = np.zeros(TOKENS_PER_BLOCK, dtype=np.int64)
ACT_PATTERN[-1] = 1
OBS_PATTERN = 1 - ACT_PATTERN
ALL_BUT_LAST_OBS_PATTERN = np.ones(TOKENS_PER_BLOCK, dtype=np.int64)
ALL_BUT_LAST_OBS_PATTERN[-2] = 0


# ----------------------------- slicer (static glue) --------------------------
def compute_slice(block_mask, max_blocks, num_steps, prev_steps=0):
    """Equivalent of iris Slicer.compute_slice (static, numpy)."""
    block_size = len(block_mask)
    num_kept = int(np.sum(block_mask))
    kept = np.where(block_mask)[0]
    indices = np.concatenate([kept + block_size * b for b in range(max_blocks)])
    total = num_steps + prev_steps
    num_blocks = math.ceil(total / block_size)
    indices = indices[: num_blocks * num_kept]
    indices = indices[(indices >= prev_steps) & (indices < total)] - prev_steps
    return indices.astype(np.int32)


# ----------------------------- kernel helpers --------------------------------
def _layernorm(x, gamma, beta):
    mean = jnp.mean(x, axis=-1, keepdims=True)
    var = jnp.mean((x - mean) * (x - mean), axis=-1, keepdims=True)
    return (x - mean) * jax.lax.rsqrt(var + LN_EPS) * gamma + beta


def _gelu_exact(x):
    # torch.nn.GELU() default = exact erf GELU. erf via Abramowitz-Stegun
    # 7.1.26 polynomial (max err 1.5e-7): only exp + VPU arithmetic needed.
    z = x * (1.0 / math.sqrt(2.0))
    az = jnp.abs(z)
    t = 1.0 / (1.0 + 0.3275911 * az)
    poly = ((((1.061405429 * t - 1.453152027) * t + 1.421413741) * t
             - 0.284496736) * t + 0.254829592) * t
    erf_abs = 1.0 - poly * jnp.exp(-az * az)
    erf_z = jnp.where(z >= 0, erf_abs, -erf_abs)
    return 0.5 * x * (1.0 + erf_z)


def _softmax_rows(scores):
    m = jnp.max(scores, axis=-1, keepdims=True)
    p = jnp.exp(scores - m)
    denom = jnp.sum(p, axis=-1, keepdims=True)
    # NOTE: approx reciprocal (EUP) -> tiny relative error vs exact softmax.
    return p * pl.reciprocal(denom, approx=True)


# ----------------------------- fused Pallas kernel ---------------------------
def world_model_fused_kernel(tok_ref, blob_ref, out_ref, *, offs, B, T):
    """Whole WorldModel forward in one kernel; weights live in one VMEM blob."""
    E = EMBED_DIM
    H = NUM_HEADS
    dh = E // H
    BT = B * T
    scale = 1.0 / math.sqrt(dh)
    f32 = jnp.float32

    def load(name, r, c):
        o = offs[name]                       # static python int (8-aligned)
        return blob_ref[o:o + r, 0:c]

    # ---- fused obs/act/pos embedding gather: ONE one-hot + ONE matmul -------
    tok = tok_ref[...]                                            # (BT,1) int32
    pos = jax.lax.broadcasted_iota(jnp.int32, (BT, 1), 0) % T
    is_act = (pos % TOKENS_PER_BLOCK) == (TOKENS_PER_BLOCK - 1)
    tok_col = jnp.where(is_act, tok + OBS_VOCAB, tok)             # table column
    pos_col = pos + (OBS_VOCAB + ACT_VOCAB)
    col = jax.lax.broadcasted_iota(jnp.int32, (BT, EMB_TABLE_ROWS), 1)
    onehot = jnp.where(jnp.logical_or(col == tok_col, col == pos_col),
                       1.0, 0.0).astype(f32)                      # 2 ones / row
    x = jnp.dot(onehot, load('emb', EMB_TABLE_ROWS, E),
                preferred_element_type=f32)                       # (BT, E)

    # additive attention bias (causal + per-batch block diag), host-precomputed
    attn_bias = load('attn_bias', BT, BT)

    # ---- transformer blocks (pre-LN GPT) ------------------------------------
    for li in range(NUM_LAYERS):
        vecs = load(f'l{li}_vecs', 8, LANES)          # all 1-row params, 1 vreg
        ln1_w, ln1_b = vecs[0:1, :E], vecs[1:2, :E]
        ln2_w, ln2_b = vecs[2:3, :E], vecs[3:4, :E]
        bproj, bfc2 = vecs[4:5, :E], vecs[5:6, :E]
        bqkv, bfc1 = vecs[6:7, :3 * E], vecs[7:8, :4 * E]
        wqkv = load(f'l{li}_wqkv', E, 3 * E)
        wproj = load(f'l{li}_wproj', E, E)
        wfc1 = load(f'l{li}_wfc1', E, 4 * E)
        wfc2 = load(f'l{li}_wfc2', 4 * E, E)

        h = _layernorm(x, ln1_w, ln1_b)
        qkv = jnp.dot(h, wqkv, preferred_element_type=f32) + bqkv   # (BT, 3E)

        head_outs = []
        for hh in range(H):
            q_h = qkv[:, hh * dh:(hh + 1) * dh]
            k_h = qkv[:, E + hh * dh:E + (hh + 1) * dh]
            v_h = qkv[:, 2 * E + hh * dh:2 * E + (hh + 1) * dh]
            s = jax.lax.dot_general(q_h, k_h, (((1,), (1,)), ((), ())),
                                    preferred_element_type=f32) * scale
            att = _softmax_rows(s + attn_bias)
            head_outs.append(jnp.dot(att, v_h, preferred_element_type=f32))
        attn = jnp.concatenate(head_outs, axis=-1)                  # (BT, E)
        x = x + jnp.dot(attn, wproj, preferred_element_type=f32) + bproj

        h2 = _layernorm(x, ln2_w, ln2_b)
        h2 = _gelu_exact(jnp.dot(h2, wfc1, preferred_element_type=f32) + bfc1)
        x = x + jnp.dot(h2, wfc2, preferred_element_type=f32) + bfc2

    # ---- final LayerNorm + fused heads, one lane-dense output slab ----------
    fvecs = load('final_vecs', 8, LANES)
    lnf_w, lnf_b = fvecs[0:1, :E], fvecs[1:2, :E]
    b1_all, b2_all = fvecs[2:3, :3 * E], fvecs[3:4, :HEAD_LANES]

    x = _layernorm(x, lnf_w, lnf_b)                                 # (BT, E)

    h1 = jnp.maximum(
        jnp.dot(x, load('head_w1', E, 3 * E), preferred_element_type=f32)
        + b1_all, 0.0)                                              # (BT, 3E)
    logits = jnp.dot(h1, load('head_w2', 3 * E, HEAD_LANES),
                     preferred_element_type=f32) + b2_all           # (BT, 96)

    # single full-width (BT, 128) unmasked store; one output DMA.
    out_ref[...] = jnp.concatenate([x, logits], axis=-1)


# ----------------------------- parameters ------------------------------------
def init_params(key):
    keys = iter(jax.random.split(key, 128))

    def nrm(shape):
        return 0.02 * jax.random.normal(next(keys), shape, jnp.float32)

    E = EMBED_DIM
    params = {
        'pos_emb': nrm((MAX_TOKENS, E)),
        'obs_emb': nrm((OBS_VOCAB, E)),
        'act_emb': nrm((ACT_VOCAB, E)),
        'ln_f_w': jnp.ones((E,), jnp.float32),
        'ln_f_b': jnp.zeros((E,), jnp.float32),
        'layers': [],
    }
    for _ in range(NUM_LAYERS):
        params['layers'].append({
            'ln1_w': jnp.ones((E,), jnp.float32),
            'ln1_b': jnp.zeros((E,), jnp.float32),
            # Q/K/V Linear layers pre-fused as one (E, 3E) matrix
            'wqkv': nrm((E, 3 * E)),
            'bqkv': jnp.zeros((3 * E,), jnp.float32),
            'wproj': nrm((E, E)), 'bproj': jnp.zeros((E,), jnp.float32),
            'ln2_w': jnp.ones((E,), jnp.float32),
            'ln2_b': jnp.zeros((E,), jnp.float32),
            'wfc1': nrm((E, 4 * E)), 'bfc1': jnp.zeros((4 * E,), jnp.float32),
            'wfc2': nrm((4 * E, E)), 'bfc2': jnp.zeros((E,), jnp.float32),
        })

    params['head_obs'] = {'w1': nrm((E, E)), 'b1': jnp.zeros((E,), jnp.float32),
                          'w2': nrm((E, OBS_VOCAB)),
                          'b2': jnp.zeros((OBS_VOCAB,), jnp.float32)}
    params['head_rew'] = {'w1': nrm((E, E)), 'b1': jnp.zeros((E,), jnp.float32),
                          'w2': nrm((E, 3)), 'b2': jnp.zeros((3,), jnp.float32)}
    params['head_end'] = {'w1': nrm((E, E)), 'b1': jnp.zeros((E,), jnp.float32),
                          'w2': nrm((E, 2)), 'b2': jnp.zeros((2,), jnp.float32)}
    return params


# ----------------------------- blob packing (host, one-time) -----------------
class _Packer:
    def __init__(self):
        self._chunks, self._off, self.offsets = [], 0, {}

    def add(self, name, arr):
        arr = np.asarray(arr, np.float32)
        if arr.ndim == 1:
            arr = arr[None, :]
        r, c = arr.shape
        assert c <= LANES
        r_pad = ((r + 7) // 8) * 8                       # 8-sublane aligned
        buf = np.zeros((r_pad, LANES), np.float32)       # 128-lane padded
        buf[:r, :c] = arr
        self.offsets[name] = self._off
        self._chunks.append(buf)
        self._off += r_pad

    def finish(self):
        return jnp.asarray(np.concatenate(self._chunks, axis=0)), dict(self.offsets)


def pack_world_model(params, B, T):
    """Pack every weight/bias/constant into one (rows, 128) f32 VMEM blob."""
    E = EMBED_DIM
    pk = _Packer()

    # fused embedding table: rows [0:16) obs, [16:20) act, [20:28) pos, pad 32
    emb = np.zeros((EMB_TABLE_ROWS, E), np.float32)
    emb[:OBS_VOCAB] = np.asarray(params['obs_emb'])
    emb[OBS_VOCAB:OBS_VOCAB + ACT_VOCAB] = np.asarray(params['act_emb'])
    emb[OBS_VOCAB + ACT_VOCAB:OBS_VOCAB + ACT_VOCAB + MAX_TOKENS] = \
        np.asarray(params['pos_emb'])
    pk.add('emb', emb)

    # additive attention bias: causal within a sequence, block-diag over batch
    BT = B * T
    r = np.arange(BT)
    allowed = (r[:, None] // T == r[None, :] // T) & \
              (r[:, None] % T >= r[None, :] % T)
    pk.add('attn_bias', np.where(allowed, 0.0, -1e30).astype(np.float32))

    for li, lyr in enumerate(params['layers']):
        vecs = np.zeros((8, LANES), np.float32)
        vecs[0, :E] = np.asarray(lyr['ln1_w'])
        vecs[1, :E] = np.asarray(lyr['ln1_b'])
        vecs[2, :E] = np.asarray(lyr['ln2_w'])
        vecs[3, :E] = np.asarray(lyr['ln2_b'])
        vecs[4, :E] = np.asarray(lyr['bproj'])
        vecs[5, :E] = np.asarray(lyr['bfc2'])
        vecs[6, :3 * E] = np.asarray(lyr['bqkv'])
        vecs[7, :4 * E] = np.asarray(lyr['bfc1'])
        pk.add(f'l{li}_vecs', vecs)
        pk.add(f'l{li}_wqkv', lyr['wqkv'])
        pk.add(f'l{li}_wproj', lyr['wproj'])
        pk.add(f'l{li}_wfc1', lyr['wfc1'])
        pk.add(f'l{li}_wfc2', lyr['wfc2'])

    # fused heads: concatenated fc1, block-diagonal fc2 (exactly equivalent to
    # the three independent Head MLPs), padded to 96 output lanes.
    ho, hr, he = params['head_obs'], params['head_rew'], params['head_end']
    w1_all = np.concatenate([np.asarray(ho['w1']), np.asarray(hr['w1']),
                             np.asarray(he['w1'])], axis=1)          # (E, 3E)
    w2_all = np.zeros((3 * E, HEAD_LANES), np.float32)
    w2_all[0:E, 0:OBS_VOCAB] = np.asarray(ho['w2'])
    w2_all[E:2 * E, OBS_VOCAB:OBS_VOCAB + 3] = np.asarray(hr['w2'])
    w2_all[2 * E:3 * E, OBS_VOCAB + 3:OBS_VOCAB + 5] = np.asarray(he['w2'])
    b1_all = np.concatenate([np.asarray(ho['b1']), np.asarray(hr['b1']),
                             np.asarray(he['b1'])])
    b2_all = np.zeros((HEAD_LANES,), np.float32)
    b2_all[0:OBS_VOCAB] = np.asarray(ho['b2'])
    b2_all[OBS_VOCAB:OBS_VOCAB + 3] = np.asarray(hr['b2'])
    b2_all[OBS_VOCAB + 3:OBS_VOCAB + 5] = np.asarray(he['b2'])

    fvecs = np.zeros((8, LANES), np.float32)
    fvecs[0, :E] = np.asarray(params['ln_f_w'])
    fvecs[1, :E] = np.asarray(params['ln_f_b'])
    fvecs[2, :3 * E] = b1_all
    fvecs[3, :HEAD_LANES] = b2_all
    pk.add('final_vecs', fvecs)
    pk.add('head_w1', w1_all)
    pk.add('head_w2', w2_all)

    return pk.finish()


# ----------------------------- forward ---------------------------------------
class WorldModelOutput(NamedTuple):
    output_sequence: jax.Array
    logits_observations: jax.Array
    logits_rewards: jax.Array
    logits_ends: jax.Array


def world_model_forward(tokens, blob, offs):
    """blob/offs must have been packed with pack_world_model for this (B, T)."""
    B, T = tokens.shape
    assert T <= MAX_TOKENS
    prev_steps = 0  # TODO(synk): past_keys_values (KV-cache) path not implemented.

    tok_flat = tokens.reshape(B * T, 1).astype(jnp.int32)
    kernel = partial(world_model_fused_kernel, offs=offs, B=B, T=T)

    slab = pl.pallas_call(
        kernel,
        out_shape=jax.ShapeDtypeStruct((B * T, LANES), jnp.float32),
        in_specs=[pl.BlockSpec(memory_space=pltpu.MemorySpace.VMEM),
                  pl.BlockSpec(memory_space=pltpu.MemorySpace.VMEM)],
        out_specs=pl.BlockSpec(memory_space=pltpu.MemorySpace.VMEM),
    )(tok_flat, blob)

    slab = slab.reshape(B, T, LANES)
    x_seq = slab[..., :EMBED_DIM]                       # ln_f(x), (B, T, E)
    head = slab[..., EMBED_DIM:]                        # fused head logits

    # static head-row selection (compile-time numpy indices) done host-side
    obs_rows = compute_slice(ALL_BUT_LAST_OBS_PATTERN, MAX_BLOCKS, T, prev_steps)
    act_rows = compute_slice(ACT_PATTERN, MAX_BLOCKS, T, prev_steps)
    logits_obs = jnp.take(head[..., :OBS_VOCAB], obs_rows, axis=1)
    logits_rew = jnp.take(head[..., OBS_VOCAB:OBS_VOCAB + 3], act_rows, axis=1)
    logits_end = jnp.take(head[..., OBS_VOCAB + 3:OBS_VOCAB + 5], act_rows, axis=1)
    return WorldModelOutput(x_seq, logits_obs, logits_rew, logits_end)


# ----------------------------- main -------------------------------------------
if __name__ == "__main__":
    key = jax.random.PRNGKey(0)
    k_par, k_obs, k_act = jax.random.split(key, 3)

    params = init_params(k_par)
    blob, offs = pack_world_model(params, BATCH, MAX_TOKENS)

    # tokens: obs positions index obs vocab, act positions index act vocab
    act_slice = compute_slice(ACT_PATTERN, MAX_BLOCKS, MAX_TOKENS, 0)
    tokens = jax.random.randint(k_obs, (BATCH, MAX_TOKENS), 0, OBS_VOCAB,
                                dtype=jnp.int32)
    act_vals = jax.random.randint(k_act, (BATCH, len(act_slice)), 0, ACT_VOCAB,
                                  dtype=jnp.int32)
    tokens = tokens.at[:, act_slice].set(act_vals)

    out = world_model_forward(tokens, blob, offs)
    jax.block_until_ready(out)

    # light sanity checks (no extra stdout)
    assert out.output_sequence.shape == (BATCH, MAX_TOKENS, EMBED_DIM)
    assert out.logits_observations.shape == (BATCH, 6, OBS_VOCAB)
    assert out.logits_rewards.shape == (BATCH, 2, 3)
    assert out.logits_ends.shape == (BATCH, 2, 2)
    assert bool(jnp.all(jnp.isfinite(out.output_sequence)))
    assert bool(jnp.all(jnp.isfinite(out.logits_observations)))
    assert bool(jnp.all(jnp.isfinite(out.logits_rewards)))
    assert bool(jnp.all(jnp.isfinite(out.logits_ends)))

    print("KERNEL_OK")
</pallas_src>

<mosaic_0001>
module attributes {stable_mosaic.version = 11 : i64} {
  func.func @world_model_fused_kernel(%arg0: memref<16x1xi32, #tpu.memory_space<vmem>>, %arg1: memref<648x128xf32, #tpu.memory_space<vmem>>, %arg2: memref<16x128xf32, #tpu.memory_space<vmem>>) attributes {dimension_semantics = [], scalar_prefetch = 0 : i64, scratch_operands = 0 : i64, tpu.core_type = #tpu.core_type<tc>} {
    %c0 = arith.constant 0 : index
    %c0_0 = arith.constant 0 : index
    %0 = vector.load %arg0[%c0, %c0_0] : memref<16x1xi32, #tpu.memory_space<vmem>>, vector<16x1xi32>
    %1 = tpu.iota {dimensions = array<i32: 0>} : vector<16x1xi32>
    %c8_i32 = arith.constant 8 : i32
    %c0_i32 = arith.constant 0 : i32
    %2 = arith.cmpi eq, %c8_i32, %c0_i32 : i32
    %c1_i32 = arith.constant 1 : i32
    %3 = arith.select %2, %c1_i32, %c8_i32 : i32
    %4 = vector.broadcast %3 : i32 to vector<16x1xi32>
    %5 = arith.remsi %1, %4 : vector<16x1xi32>
    %c0_i32_1 = arith.constant 0 : i32
    %6 = vector.broadcast %c0_i32_1 : i32 to vector<16x1xi32>
    %7 = arith.cmpi ne, %5, %6 : vector<16x1xi32>
    %c0_i32_2 = arith.constant 0 : i32
    %8 = vector.broadcast %c0_i32_2 : i32 to vector<16x1xi32>
    %9 = arith.cmpi slt, %5, %8 : vector<16x1xi32>
    %c0_i32_3 = arith.constant 0 : i32
    %10 = arith.cmpi slt, %3, %c0_i32_3 : i32
    %11 = vector.broadcast %10 : i1 to vector<16x1xi1>
    %12 = vector.broadcast %11 : vector<16x1xi1> to vector<16x1xi1>
    %13 = arith.xori %9, %12 : vector<16x1xi1>
    %14 = arith.andi %13, %7 : vector<16x1xi1>
    %15 = vector.broadcast %3 : i32 to vector<16x1xi32>
    %16 = arith.addi %5, %15 : vector<16x1xi32>
    %17 = arith.select %14, %16, %5 : vector<16x1xi1>, vector<16x1xi32>
    %c4_i32 = arith.constant 4 : i32
    %c0_i32_4 = arith.constant 0 : i32
    %18 = arith.cmpi eq, %c4_i32, %c0_i32_4 : i32
    %c1_i32_5 = arith.constant 1 : i32
    %19 = arith.select %18, %c1_i32_5, %c4_i32 : i32
    %20 = vector.broadcast %19 : i32 to vector<16x1xi32>
    %21 = arith.remsi %17, %20 : vector<16x1xi32>
    %c0_i32_6 = arith.constant 0 : i32
    %22 = vector.broadcast %c0_i32_6 : i32 to vector<16x1xi32>
    %23 = arith.cmpi ne, %21, %22 : vector<16x1xi32>
    %c0_i32_7 = arith.constant 0 : i32
    %24 = vector.broadcast %c0_i32_7 : i32 to vector<16x1xi32>
    %25 = arith.cmpi slt, %21, %24 : vector<16x1xi32>
    %c0_i32_8 = arith.constant 0 : i32
    %26 = arith.cmpi slt, %19, %c0_i32_8 : i32
    %27 = vector.broadcast %26 : i1 to vector<16x1xi1>
    %28 = vector.broadcast %27 : vector<16x1xi1> to vector<16x1xi1>
    %29 = arith.xori %25, %28 : vector<16x1xi1>
    %30 = arith.andi %29, %23 : vector<16x1xi1>
    %31 = vector.broadcast %19 : i32 to vector<16x1xi32>
    %32 = arith.addi %21, %31 : vector<16x1xi32>
    %33 = arith.select %30, %32, %21 : vector<16x1xi1>, vector<16x1xi32>
    %c3_i32 = arith.constant 3 : i32
    %34 = vector.broadcast %c3_i32 : i32 to vector<16x1xi32>
    %35 = arith.cmpi eq, %33, %34 : vector<16x1xi32>
    %c16_i32 = arith.constant 16 : i32
    %36 = vector.broadcast %c16_i32 : i32 to vector<16x1xi32>
    %37 = arith.addi %0, %36 : vector<16x1xi32>
    %38 = arith.select %35, %37, %0 : vector<16x1xi1>, vector<16x1xi32>
    %c20_i32 = arith.constant 20 : i32
    %39 = vector.broadcast %c20_i32 : i32 to vector<16x1xi32>
    %40 = arith.addi %17, %39 : vector<16x1xi32>
    %41 = tpu.iota {dimensions = array<i32: 1>} : vector<16x32xi32>
    %42 = vector.broadcast %38 : vector<16x1xi32> to vector<16x32xi32>
    %43 = arith.cmpi eq, %41, %42 : vector<16x32xi32>
    %44 = vector.broadcast %40 : vector<16x1xi32> to vector<16x32xi32>
    %45 = arith.cmpi eq, %41, %44 : vector<16x32xi32>
    %46 = arith.ori %43, %45 : vector<16x32xi1>
    %cst = arith.constant 1.000000e+00 : f32
    %cst_9 = arith.constant 0.000000e+00 : f32
    %47 = vector.broadcast %cst : f32 to vector<16x32xf32>
    %48 = vector.broadcast %cst_9 : f32 to vector<16x32xf32>
    %49 = arith.select %46, %47, %48 : vector<16x32xi1>, vector<16x32xf32>
    %c0_10 = arith.constant 0 : index
    %c0_11 = arith.constant 0 : index
    %50 = vector.load %arg1[%c0_10, %c0_11] : memref<648x128xf32, #tpu.memory_space<vmem>>, vector<32x32xf32>
    %cst_12 = arith.constant dense<0.000000e+00> : vector<16x32xf32>
    %51 = tpu.matmul %49, %50, %cst_12 {dimension_numbers = #tpu.dot_dimension_numbers<[1], [0], [0], [1], [0, 0, 1, 1], [], []>} : vector<16x32xf32>, vector<32x32xf32>, vector<16x32xf32> -> vector<16x32xf32>
    %c32 = arith.constant 32 : index
    %c0_13 = arith.constant 0 : index
    %52 = vector.load %arg1[%c32, %c0_13] : memref<648x128xf32, #tpu.memory_space<vmem>>, vector<16x16xf32>
    %c48 = arith.constant 48 : index
    %c0_14 = arith.constant 0 : index
    %53 = vector.load %arg1[%c48, %c0_14] : memref<648x128xf32, #tpu.memory_space<vmem>>, vector<8x128xf32>
    %54 = vector.extract_strided_slice %53 {offsets = [0, 0], sizes = [1, 32], strides = [1, 1]} : vector<8x128xf32> to vector<1x32xf32>
    %55 = vector.extract_strided_slice %53 {offsets = [1, 0], sizes = [1, 32], strides = [1, 1]} : vector<8x128xf32> to vector<1x32xf32>
    %56 = vector.extract_strided_slice %53 {offsets = [2, 0], sizes = [1, 32], strides = [1, 1]} : vector<8x128xf32> to vector<1x32xf32>
    %57 = vector.extract_strided_slice %53 {offsets = [3, 0], sizes = [1, 32], strides = [1, 1]} : vector<8x128xf32> to vector<1x32xf32>
    %58 = vector.extract_strided_slice %53 {offsets = [4, 0], sizes = [1, 32], strides = [1, 1]} : vector<8x128xf32> to vector<1x32xf32>
    %59 = vector.extract_strided_slice %53 {offsets = [5, 0], sizes = [1, 32], strides = [1, 1]} : vector<8x128xf32> to vector<1x32xf32>
    %60 = vector.extract_strided_slice %53 {offsets = [6, 0], sizes = [1, 96], strides = [1, 1]} : vector<8x128xf32> to vector<1x96xf32>
    %61 = vector.extract_strided_slice %53 {offsets = [7, 0], sizes = [1, 128], strides = [1, 1]} : vector<8x128xf32> to vector<1x128xf32>
    %c56 = arith.constant 56 : index
    %c0_15 = arith.constant 0 : index
    %62 = vector.load %arg1[%c56, %c0_15] : memref<648x128xf32, #tpu.memory_space<vmem>>, vector<32x96xf32>
    %c88 = arith.constant 88 : index
    %c0_16 = arith.constant 0 : index
    %63 = vector.load %arg1[%c88, %c0_16] : memref<648x128xf32, #tpu.memory_space<vmem>>, vector<32x32xf32>
    %c120 = arith.constant 120 : index
    %c0_17 = arith.constant 0 : index
    %64 = vector.load %arg1[%c120, %c0_17] : memref<648x128xf32, #tpu.memory_space<vmem>>, vector<32x128xf32>
    %c152 = arith.constant 152 : index
    %c0_18 = arith.constant 0 : index
    %65 = vector.load %arg1[%c152, %c0_18] : memref<648x128xf32, #tpu.memory_space<vmem>>, vector<128x32xf32>
    %cst_19 = arith.constant dense<0.000000e+00> : vector<16xf32>
    %66 = vector.multi_reduction <add>, %51, %cst_19 [1] : vector<16x32xf32> to vector<16xf32>
    %67 = vector.shape_cast %66 : vector<16xf32> to vector<16x1xf32>
    %cst_20 = arith.constant 3.200000e+01 : f32
    %68 = vector.broadcast %cst_20 : f32 to vector<16x1xf32>
    %69 = arith.divf %67, %68 : vector<16x1xf32>
    %70 = vector.broadcast %69 : vector<16x1xf32> to vector<16x32xf32>
    %71 = arith.subf %51, %70 : vector<16x32xf32>
    %72 = vector.broadcast %69 : vector<16x1xf32> to vector<16x32xf32>
    %73 = arith.subf %51, %72 : vector<16x32xf32>
    %74 = arith.mulf %71, %73 : vector<16x32xf32>
    %cst_21 = arith.constant dense<0.000000e+00> : vector<16xf32>
    %75 = vector.multi_reduction <add>, %74, %cst_21 [1] : vector<16x32xf32> to vector<16xf32>
    %76 = vector.shape_cast %75 : vector<16xf32> to vector<16x1xf32>
    %cst_22 = arith.constant 3.200000e+01 : f32
    %77 = vector.broadcast %cst_22 : f32 to vector<16x1xf32>
    %78 = arith.divf %76, %77 : vector<16x1xf32>
    %79 = vector.broadcast %69 : vector<16x1xf32> to vector<16x32xf32>
    %80 = arith.subf %51, %79 : vector<16x32xf32>
    %cst_23 = arith.constant 9.99999974E-6 : f32
    %81 = vector.broadcast %cst_23 : f32 to vector<16x1xf32>
    %82 = arith.addf %78, %81 : vector<16x1xf32>
    %83 = math.rsqrt %82 : vector<16x1xf32>
    %84 = vector.broadcast %83 : vector<16x1xf32> to vector<16x32xf32>
    %85 = arith.mulf %80, %84 : vector<16x32xf32>
    %86 = vector.broadcast %54 : vector<1x32xf32> to vector<16x32xf32>
    %87 = arith.mulf %85, %86 : vector<16x32xf32>
    %88 = vector.broadcast %55 : vector<1x32xf32> to vector<16x32xf32>
    %89 = arith.addf %87, %88 : vector<16x32xf32>
    %cst_24 = arith.constant dense<0.000000e+00> : vector<16x96xf32>
    %90 = tpu.matmul %89, %62, %cst_24 {dimension_numbers = #tpu.dot_dimension_numbers<[1], [0], [0], [1], [0, 0, 1, 1], [], []>} : vector<16x32xf32>, vector<32x96xf32>, vector<16x96xf32> -> vector<16x96xf32>
    %91 = vector.broadcast %60 : vector<1x96xf32> to vector<16x96xf32>
    %92 = arith.addf %90, %91 : vector<16x96xf32>
    %93 = vector.extract_strided_slice %92 {offsets = [0, 0], sizes = [16, 16], strides = [1, 1]} : vector<16x96xf32> to vector<16x16xf32>
    %94 = vector.extract_strided_slice %92 {offsets = [0, 32], sizes = [16, 16], strides = [1, 1]} : vector<16x96xf32> to vector<16x16xf32>
    %95 = vector.extract_strided_slice %92 {offsets = [0, 64], sizes = [16, 16], strides = [1, 1]} : vector<16x96xf32> to vector<16x16xf32>
    %cst_25 = arith.constant dense<0.000000e+00> : vector<16x16xf32>
    %96 = tpu.matmul %93, %94, %cst_25 {dimension_numbers = #tpu.dot_dimension_numbers<[1], [1], [0], [0], [0, 0, 1, 0], [], []>} : vector<16x16xf32>, vector<16x16xf32>, vector<16x16xf32> -> vector<16x16xf32>
    %cst_26 = arith.constant 2.500000e-01 : f32
    %97 = vector.broadcast %cst_26 : f32 to vector<16x16xf32>
    %98 = arith.mulf %96, %97 : vector<16x16xf32>
    %99 = arith.addf %98, %52 : vector<16x16xf32>
    %cst_27 = arith.constant dense<0xFF800000> : vector<16xf32>
    %100 = vector.multi_reduction <maximumf>, %99, %cst_27 [1] : vector<16x16xf32> to vector<16xf32>
    %101 = vector.shape_cast %100 : vector<16xf32> to vector<16x1xf32>
    %102 = vector.broadcast %101 : vector<16x1xf32> to vector<16x16xf32>
    %103 = arith.subf %99, %102 : vector<16x16xf32>
    %104 = math.exp %103 : vector<16x16xf32>
    %cst_28 = arith.constant dense<0.000000e+00> : vector<16xf32>
    %105 = vector.multi_reduction <add>, %104, %cst_28 [1] : vector<16x16xf32> to vector<16xf32>
    %106 = vector.shape_cast %105 : vector<16xf32> to vector<16x1xf32>
    %107 = tpu.reciprocal %106 {approx = true} : vector<16x1xf32> -> vector<16x1xf32>
    %108 = vector.broadcast %107 : vector<16x1xf32> to vector<16x16xf32>
    %109 = arith.mulf %104, %108 : vector<16x16xf32>
    %cst_29 = arith.constant dense<0.000000e+00> : vector<16x16xf32>
    %110 = tpu.matmul %109, %95, %cst_29 {dimension_numbers = #tpu.dot_dimension_numbers<[1], [0], [0], [1], [0, 0, 1, 1], [], []>} : vector<16x16xf32>, vector<16x16xf32>, vector<16x16xf32> -> vector<16x16xf32>
    %111 = vector.extract_strided_slice %92 {offsets = [0, 16], sizes = [16, 16], strides = [1, 1]} : vector<16x96xf32> to vector<16x16xf32>
    %112 = vector.extract_strided_slice %92 {offsets = [0, 48], sizes = [16, 16], strides = [1, 1]} : vector<16x96xf32> to vector<16x16xf32>
    %113 = vector.extract_strided_slice %92 {offsets = [0, 80], sizes = [16, 16], strides = [1, 1]} : vector<16x96xf32> to vector<16x16xf32>
    %cst_30 = arith.constant dense<0.000000e+00> : vector<16x16xf32>
    %114 = tpu.matmul %111, %112, %cst_30 {dimension_numbers = #tpu.dot_dimension_numbers<[1], [1], [0], [0], [0, 0, 1, 0], [], []>} : vector<16x16xf32>, vector<16x16xf32>, vector<16x16xf32> -> vector<16x16xf32>
    %cst_31 = arith.constant 2.500000e-01 : f32
    %115 = vector.broadcast %cst_31 : f32 to vector<16x16xf32>
    %116 = arith.mulf %114, %115 : vector<16x16xf32>
    %117 = arith.addf %116, %52 : vector<16x16xf32>
    %cst_32 = arith.constant dense<0xFF800000> : vector<16xf32>
    %118 = vector.multi_reduction <maximumf>, %117, %cst_32 [1] : vector<16x16xf32> to vector<16xf32>
    %119 = vector.shape_cast %118 : vector<16xf32> to vector<16x1xf32>
    %120 = vector.broadcast %119 : vector<16x1xf32> to vector<16x16xf32>
    %121 = arith.subf %117, %120 : vector<16x16xf32>
    %122 = math.exp %121 : vector<16x16xf32>
    %cst_33 = arith.constant dense<0.000000e+00> : vector<16xf32>
    %123 = vector.multi_reduction <add>, %122, %cst_33 [1] : vector<16x16xf32> to vector<16xf32>
    %124 = vector.shape_cast %123 : vector<16xf32> to vector<16x1xf32>
    %125 = tpu.reciprocal %124 {approx = true} : vector<16x1xf32> -> vector<16x1xf32>
    %126 = vector.broadcast %125 : vector<16x1xf32> to vector<16x16xf32>
    %127 = arith.mulf %122, %126 : vector<16x16xf32>
    %cst_34 = arith.constant dense<0.000000e+00> : vector<16x16xf32>
    %128 = tpu.matmul %127, %113, %cst_34 {dimension_numbers = #tpu.dot_dimension_numbers<[1], [0], [0], [1], [0, 0, 1, 1], [], []>} : vector<16x16xf32>, vector<16x16xf32>, vector<16x16xf32> -> vector<16x16xf32>
    %129 = tpu.concatenate %110, %128 in 1 : vector<16x16xf32>, vector<16x16xf32> -> vector<16x32xf32>
    %cst_35 = arith.constant dense<0.000000e+00> : vector<16x32xf32>
    %130 = tpu.matmul %129, %63, %cst_35 {dimension_numbers = #tpu.dot_dimension_numbers<[1], [0], [0], [1], [0, 0, 1, 1], [], []>} : vector<16x32xf32>, vector<32x32xf32>, vector<16x32xf32> -> vector<16x32xf32>
    %131 = arith.addf %51, %130 : vector<16x32xf32>
    %132 = vector.broadcast %58 : vector<1x32xf32> to vector<16x32xf32>
    %133 = arith.addf %131, %132 : vector<16x32xf32>
    %cst_36 = arith.constant dense<0.000000e+00> : vector<16xf32>
    %134 = vector.multi_reduction <add>, %133, %cst_36 [1] : vector<16x32xf32> to vector<16xf32>
    %135 = vector.shape_cast %134 : vector<16xf32> to vector<16x1xf32>
    %cst_37 = arith.constant 3.200000e+01 : f32
    %136 = vector.broadcast %cst_37 : f32 to vector<16x1xf32>
    %137 = arith.divf %135, %136 : vector<16x1xf32>
    %138 = vector.broadcast %137 : vector<16x1xf32> to vector<16x32xf32>
    %139 = arith.subf %133, %138 : vector<16x32xf32>
    %140 = vector.broadcast %137 : vector<16x1xf32> to vector<16x32xf32>
    %141 = arith.subf %133, %140 : vector<16x32xf32>
    %142 = arith.mulf %139, %141 : vector<16x32xf32>
    %cst_38 = arith.constant dense<0.000000e+00> : vector<16xf32>
    %143 = vector.multi_reduction <add>, %142, %cst_38 [1] : vector<16x32xf32> to vector<16xf32>
    %144 = vector.shape_cast %143 : vector<16xf32> to vector<16x1xf32>
    %cst_39 = arith.constant 3.200000e+01 : f32
    %145 = vector.broadcast %cst_39 : f32 to vector<16x1xf32>
    %146 = arith.divf %144, %145 : vector<16x1xf32>
    %147 = vector.broadcast %137 : vector<16x1xf32> to vector<16x32xf32>
    %148 = arith.subf %133, %147 : vector<16x32xf32>
    %cst_40 = arith.constant 9.99999974E-6 : f32
    %149 = vector.broadcast %cst_40 : f32 to vector<16x1xf32>
    %150 = arith.addf %146, %149 : vector<16x1xf32>
    %151 = math.rsqrt %150 : vector<16x1xf32>
    %152 = vector.broadcast %151 : vector<16x1xf32> to vector<16x32xf32>
    %153 = arith.mulf %148, %152 : vector<16x32xf32>
    %154 = vector.broadcast %56 : vector<1x32xf32> to vector<16x32xf32>
    %155 = arith.mulf %153, %154 : vector<16x32xf32>
    %156 = vector.broadcast %57 : vector<1x32xf32> to vector<16x32xf32>
    %157 = arith.addf %155, %156 : vector<16x32xf32>
    %cst_41 = arith.constant dense<0.000000e+00> : vector<16x128xf32>
    %158 = tpu.matmul %157, %64, %cst_41 {dimension_numbers = #tpu.dot_dimension_numbers<[1], [0], [0], [1], [0, 0, 1, 1], [], []>} : vector<16x32xf32>, vector<32x128xf32>, vector<16x128xf32> -> vector<16x128xf32>
    %159 = vector.broadcast %61 : vector<1x128xf32> to vector<16x128xf32>
    %160 = arith.addf %158, %159 : vector<16x128xf32>
    %cst_42 = arith.constant 0.707106769 : f32
    %161 = vector.broadcast %cst_42 : f32 to vector<16x128xf32>
    %162 = arith.mulf %160, %161 : vector<16x128xf32>
    %163 = math.absf %162 : vector<16x128xf32>
    %cst_43 = arith.constant 0.327591091 : f32
    %164 = vector.broadcast %cst_43 : f32 to vector<16x128xf32>
    %165 = arith.mulf %164, %163 : vector<16x128xf32>
    %cst_44 = arith.constant 1.000000e+00 : f32
    %166 = vector.broadcast %cst_44 : f32 to vector<16x128xf32>
    %167 = arith.addf %166, %165 : vector<16x128xf32>
    %cst_45 = arith.constant 1.000000e+00 : f32
    %168 = vector.broadcast %cst_45 : f32 to vector<16x128xf32>
    %169 = arith.divf %168, %167 : vector<16x128xf32>
    %cst_46 = arith.constant 1.06140542 : f32
    %170 = vector.broadcast %cst_46 : f32 to vector<16x128xf32>
    %171 = arith.mulf %170, %169 : vector<16x128xf32>
    %cst_47 = arith.constant 1.45315206 : f32
    %172 = vector.broadcast %cst_47 : f32 to vector<16x128xf32>
    %173 = arith.subf %171, %172 : vector<16x128xf32>
    %174 = arith.mulf %173, %169 : vector<16x128xf32>
    %cst_48 = arith.constant 1.42141378 : f32
    %175 = vector.broadcast %cst_48 : f32 to vector<16x128xf32>
    %176 = arith.addf %174, %175 : vector<16x128xf32>
    %177 = arith.mulf %176, %169 : vector<16x128xf32>
    %cst_49 = arith.constant 0.284496725 : f32
    %178 = vector.broadcast %cst_49 : f32 to vector<16x128xf32>
    %179 = arith.subf %177, %178 : vector<16x128xf32>
    %180 = arith.mulf %179, %169 : vector<16x128xf32>
    %cst_50 = arith.constant 0.254829586 : f32
    %181 = vector.broadcast %cst_50 : f32 to vector<16x128xf32>
    %182 = arith.addf %180, %181 : vector<16x128xf32>
    %183 = arith.mulf %182, %169 : vector<16x128xf32>
    %cst_51 = arith.constant 0.000000e+00 : f32
    %184 = vector.broadcast %cst_51 : f32 to vector<16x128xf32>
    %185 = arith.subf %184, %163 : vector<16x128xf32>
    %186 = arith.mulf %185, %163 : vector<16x128xf32>
    %187 = math.exp %186 : vector<16x128xf32>
    %188 = arith.mulf %183, %187 : vector<16x128xf32>
    %cst_52 = arith.constant 1.000000e+00 : f32
    %189 = vector.broadcast %cst_52 : f32 to vector<16x128xf32>
    %190 = arith.subf %189, %188 : vector<16x128xf32>
    %cst_53 = arith.constant 0.000000e+00 : f32
    %191 = vector.broadcast %cst_53 : f32 to vector<16x128xf32>
    %192 = arith.cmpf oge, %162, %191 : vector<16x128xf32>
    %cst_54 = arith.constant 0.000000e+00 : f32
    %193 = vector.broadcast %cst_54 : f32 to vector<16x128xf32>
    %194 = arith.subf %193, %190 : vector<16x128xf32>
    %195 = arith.select %192, %190, %194 : vector<16x128xi1>, vector<16x128xf32>
    %cst_55 = arith.constant 5.000000e-01 : f32
    %196 = vector.broadcast %cst_55 : f32 to vector<16x128xf32>
    %197 = arith.mulf %196, %160 : vector<16x128xf32>
    %cst_56 = arith.constant 1.000000e+00 : f32
    %198 = vector.broadcast %cst_56 : f32 to vector<16x128xf32>
    %199 = arith.addf %198, %195 : vector<16x128xf32>
    %200 = arith.mulf %197, %199 : vector<16x128xf32>
    %cst_57 = arith.constant dense<0.000000e+00> : vector<16x32xf32>
    %201 = tpu.matmul %200, %65, %cst_57 {dimension_numbers = #tpu.dot_dimension_numbers<[1], [0], [0], [1], [0, 0, 1, 1], [], []>} : vector<16x128xf32>, vector<128x32xf32>, vector<16x32xf32> -> vector<16x32xf32>
    %202 = arith.addf %133, %201 : vector<16x32xf32>
    %203 = vector.broadcast %59 : vector<1x32xf32> to vector<16x32xf32>
    %204 = arith.addf %202, %203 : vector<16x32xf32>
    %c280 = arith.constant 280 : index
    %c0_58 = arith.constant 0 : index
    %205 = vector.load %arg1[%c280, %c0_58] : memref<648x128xf32, #tpu.memory_space<vmem>>, vector<8x128xf32>
    %206 = vector.extract_strided_slice %205 {offsets = [0, 0], sizes = [1, 32], strides = [1, 1]} : vector<8x128xf32> to vector<1x32xf32>
    %207 = vector.extract_strided_slice %205 {offsets = [1, 0], sizes = [1, 32], strides = [1, 1]} : vector<8x128xf32> to vector<1x32xf32>
    %208 = vector.extract_strided_slice %205 {offsets = [2, 0], sizes = [1, 32], strides = [1, 1]} : vector<8x128xf32> to vector<1x32xf32>
    %209 = vector.extract_strided_slice %205 {offsets = [3, 0], sizes = [1, 32], strides = [1, 1]} : vector<8x128xf32> to vector<1x32xf32>
    %210 = vector.extract_strided_slice %205 {offsets = [4, 0], sizes = [1, 32], strides = [1, 1]} : vector<8x128xf32> to vector<1x32xf32>
    %211 = vector.extract_strided_slice %205 {offsets = [5, 0], sizes = [1, 32], strides = [1, 1]} : vector<8x128xf32> to vector<1x32xf32>
    %212 = vector.extract_strided_slice %205 {offsets = [6, 0], sizes = [1, 96], strides = [1, 1]} : vector<8x128xf32> to vector<1x96xf32>
    %213 = vector.extract_strided_slice %205 {offsets = [7, 0], sizes = [1, 128], strides = [1, 1]} : vector<8x128xf32> to vector<1x128xf32>
    %c288 = arith.constant 288 : index
    %c0_59 = arith.constant 0 : index
    %214 = vector.load %arg1[%c288, %c0_59] : memref<648x128xf32, #tpu.memory_space<vmem>>, vector<32x96xf32>
    %c320 = arith.constant 320 : index
    %c0_60 = arith.constant 0 : index
    %215 = vector.load %arg1[%c320, %c0_60] : memref<648x128xf32, #tpu.memory_space<vmem>>, vector<32x32xf32>
    %c352 = arith.constant 352 : index
    %c0_61 = arith.constant 0 : index
    %216 = vector.load %arg1[%c352, %c0_61] : memref<648x128xf32, #tpu.memory_space<vmem>>, vector<32x128xf32>
    %c384 = arith.constant 384 : index
    %c0_62 = arith.constant 0 : index
    %217 = vector.load %arg1[%c384, %c0_62] : memref<648x128xf32, #tpu.memory_space<vmem>>, vector<128x32xf32>
    %cst_63 = arith.constant dense<0.000000e+00> : vector<16xf32>
    %218 = vector.multi_reduction <add>, %204, %cst_63 [1] : vector<16x32xf32> to vector<16xf32>
    %219 = vector.shape_cast %218 : vector<16xf32> to vector<16x1xf32>
    %cst_64 = arith.constant 3.200000e+01 : f32
    %220 = vector.broadcast %cst_64 : f32 to vector<16x1xf32>
    %221 = arith.divf %219, %220 : vector<16x1xf32>
    %222 = vector.broadcast %221 : vector<16x1xf32> to vector<16x32xf32>
    %223 = arith.subf %204, %222 : vector<16x32xf32>
    %224 = vector.broadcast %221 : vector<16x1xf32> to vector<16x32xf32>
    %225 = arith.subf %204, %224 : vector<16x32xf32>
    %226 = arith.mulf %223, %225 : vector<16x32xf32>
    %cst_65 = arith.constant dense<0.000000e+00> : vector<16xf32>
    %227 = vector.multi_reduction <add>, %226, %cst_65 [1] : vector<16x32xf32> to vector<16xf32>
    %228 = vector.shape_cast %227 : vector<16xf32> to vector<16x1xf32>
    %cst_66 = arith.constant 3.200000e+01 : f32
    %229 = vector.broadcast %cst_66 : f32 to vector<16x1xf32>
    %230 = arith.divf %228, %229 : vector<16x1xf32>
    %231 = vector.broadcast %221 : vector<16x1xf32> to vector<16x32xf32>
    %232 = arith.subf %204, %231 : vector<16x32xf32>
    %cst_67 = arith.constant 9.99999974E-6 : f32
    %233 = vector.broadcast %cst_67 : f32 to vector<16x1xf32>
    %234 = arith.addf %230, %233 : vector<16x1xf32>
    %235 = math.rsqrt %234 : vector<16x1xf32>
    %236 = vector.broadcast %235 : vector<16x1xf32> to vector<16x32xf32>
    %237 = arith.mulf %232, %236 : vector<16x32xf32>
    %238 = vector.broadcast %206 : vector<1x32xf32> to vector<16x32xf32>
    %239 = arith.mulf %237, %238 : vector<16x32xf32>
    %240 = vector.broadcast %207 : vector<1x32xf32> to vector<16x32xf32>
    %241 = arith.addf %239, %240 : vector<16x32xf32>
    %cst_68 = arith.constant dense<0.000000e+00> : vector<16x96xf32>
    %242 = tpu.matmul %241, %214, %cst_68 {dimension_numbers = #tpu.dot_dimension_numbers<[1], [0], [0], [1], [0, 0, 1, 1], [], []>} : vector<16x32xf32>, vector<32x96xf32>, vector<16x96xf32> -> vector<16x96xf32>
    %243 = vector.broadcast %212 : vector<1x96xf32> to vector<16x96xf32>
    %244 = arith.addf %242, %243 : vector<16x96xf32>
    %245 = vector.extract_strided_slice %244 {offsets = [0, 0], sizes = [16, 16], strides = [1, 1]} : vector<16x96xf32> to vector<16x16xf32>
    %246 = vector.extract_strided_slice %244 {offsets = [0, 32], sizes = [16, 16], strides = [1, 1]} : vector<16x96xf32> to vector<16x16xf32>
    %247 = vector.extract_strided_slice %244 {offsets = [0, 64], sizes = [16, 16], strides = [1, 1]} : vector<16x96xf32> to vector<16x16xf32>
    %cst_69 = arith.constant dense<0.000000e+00> : vector<16x16xf32>
    %248 = tpu.matmul %245, %246, %cst_69 {dimension_numbers = #tpu.dot_dimension_numbers<[1], [1], [0], [0], [0, 0, 1, 0], [], []>} : vector<16x16xf32>, vector<16x16xf32>, vector<16x16xf32> -> vector<16x16xf32>
    %cst_70 = arith.constant 2.500000e-01 : f32
    %249 = vector.broadcast %cst_70 : f32 to vector<16x16xf32>
    %250 = arith.mulf %248, %249 : vector<16x16xf32>
    %251 = arith.addf %250, %52 : vector<16x16xf32>
    %cst_71 = arith.constant dense<0xFF800000> : vector<16xf32>
    %252 = vector.multi_reduction <maximumf>, %251, %cst_71 [1] : vector<16x16xf32> to vector<16xf32>
    %253 = vector.shape_cast %252 : vector<16xf32> to vector<16x1xf32>
    %254 = vector.broadcast %253 : vector<16x1xf32> to vector<16x16xf32>
    %255 = arith.subf %251, %254 : vector<16x16xf32>
    %256 = math.exp %255 : vector<16x16xf32>
    %cst_72 = arith.constant dense<0.000000e+00> : vector<16xf32>
    %257 = vector.multi_reduction <add>, %256, %cst_72 [1] : vector<16x16xf32> to vector<16xf32>
    %258 = vector.shape_cast %257 : vector<16xf32> to vector<16x1xf32>
    %259 = tpu.reciprocal %258 {approx = true} : vector<16x1xf32> -> vector<16x1xf32>
    %260 = vector.broadcast %259 : vector<16x1xf32> to vector<16x16xf32>
    %261 = arith.mulf %256, %260 : vector<16x16xf32>
    %cst_73 = arith.constant dense<0.000000e+00> : vector<16x16xf32>
    %262 = tpu.matmul %261, %247, %cst_73 {dimension_numbers = #tpu.dot_dimension_numbers<[1], [0], [0], [1], [0, 0, 1, 1], [], []>} : vector<16x16xf32>, vector<16x16xf32>, vector<16x16xf32> -> vector<16x16xf32>
    %263 = vector.extract_strided_slice %244 {offsets = [0, 16], sizes = [16, 16], strides = [1, 1]} : vector<16x96xf32> to vector<16x16xf32>
    %264 = vector.extract_strided_slice %244 {offsets = [0, 48], sizes = [16, 16], strides = [1, 1]} : vector<16x96xf32> to vector<16x16xf32>
    %265 = vector.extract_strided_slice %244 {offsets = [0, 80], sizes = [16, 16], strides = [1, 1]} : vector<16x96xf32> to vector<16x16xf32>
    %cst_74 = arith.constant dense<0.000000e+00> : vector<16x16xf32>
    %266 = tpu.matmul %263, %264, %cst_74 {dimension_numbers = #tpu.dot_dimension_numbers<[1], [1], [0], [0], [0, 0, 1, 0], [], []>} : vector<16x16xf32>, vector<16x16xf32>, vector<16x16xf32> -> vector<16x16xf32>
    %cst_75 = arith.constant 2.500000e-01 : f32
    %267 = vector.broadcast %cst_75 : f32 to vector<16x16xf32>
    %268 = arith.mulf %266, %267 : vector<16x16xf32>
    %269 = arith.addf %268, %52 : vector<16x16xf32>
    %cst_76 = arith.constant dense<0xFF800000> : vector<16xf32>
    %270 = vector.multi_reduction <maximumf>, %269, %cst_76 [1] : vector<16x16xf32> to vector<16xf32>
    %271 = vector.shape_cast %270 : vector<16xf32> to vector<16x1xf32>
    %272 = vector.broadcast %271 : vector<16x1xf32> to vector<16x16xf32>
    %273 = arith.subf %269, %272 : vector<16x16xf32>
    %274 = math.exp %273 : vector<16x16xf32>
    %cst_77 = arith.constant dense<0.000000e+00> : vector<16xf32>
    %275 = vector.multi_reduction <add>, %274, %cst_77 [1] : vector<16x16xf32> to vector<16xf32>
    %276 = vector.shape_cast %275 : vector<16xf32> to vector<16x1xf32>
    %277 = tpu.reciprocal %276 {approx = true} : vector<16x1xf32> -> vector<16x1xf32>
    %278 = vector.broadcast %277 : vector<16x1xf32> to vector<16x16xf32>
    %279 = arith.mulf %274, %278 : vector<16x16xf32>
    %cst_78 = arith.constant dense<0.000000e+00> : vector<16x16xf32>
    %280 = tpu.matmul %279, %265, %cst_78 {dimension_numbers = #tpu.dot_dimension_numbers<[1], [0], [0], [1], [0, 0, 1, 1], [], []>} : vector<16x16xf32>, vector<16x16xf32>, vector<16x16xf32> -> vector<16x16xf32>
    %281 = tpu.concatenate %262, %280 in 1 : vector<16x16xf32>, vector<16x16xf32> -> vector<16x32xf32>
    %cst_79 = arith.constant dense<0.000000e+00> : vector<16x32xf32>
    %282 = tpu.matmul %281, %215, %cst_79 {dimension_numbers = #tpu.dot_dimension_numbers<[1], [0], [0], [1], [0, 0, 1, 1], [], []>} : vector<16x32xf32>, vector<32x32xf32>, vector<16x32xf32> -> vector<16x32xf32>
    %283 = arith.addf %204, %282 : vector<16x32xf32>
    %284 = vector.broadcast %210 : vector<1x32xf32> to vector<16x32xf32>
    %285 = arith.addf %283, %284 : vector<16x32xf32>
    %cst_80 = arith.constant dense<0.000000e+00> : vector<16xf32>
    %286 = vector.multi_reduction <add>, %285, %cst_80 [1] : vector<16x32xf32> to vector<16xf32>
    %287 = vector.shape_cast %286 : vector<16xf32> to vector<16x1xf32>
    %cst_81 = arith.constant 3.200000e+01 : f32
    %288 = vector.broadcast %cst_81 : f32 to vector<16x1xf32>
    %289 = arith.divf %287, %288 : vector<16x1xf32>
    %290 = vector.broadcast %289 : vector<16x1xf32> to vector<16x32xf32>
    %291 = arith.subf %285, %290 : vector<16x32xf32>
    %292 = vector.broadcast %289 : vector<16x1xf32> to vector<16x32xf32>
    %293 = arith.subf %285, %292 : vector<16x32xf32>
    %294 = arith.mulf %291, %293 : vector<16x32xf32>
    %cst_82 = arith.constant dense<0.000000e+00> : vector<16xf32>
    %295 = vector.multi_reduction <add>, %294, %cst_82 [1] : vector<16x32xf32> to vector<16xf32>
    %296 = vector.shape_cast %295 : vector<16xf32> to vector<16x1xf32>
    %cst_83 = arith.constant 3.200000e+01 : f32
    %297 = vector.broadcast %cst_83 : f32 to vector<16x1xf32>
    %298 = arith.divf %296, %297 : vector<16x1xf32>
    %299 = vector.broadcast %289 : vector<16x1xf32> to vector<16x32xf32>
    %300 = arith.subf %285, %299 : vector<16x32xf32>
    %cst_84 = arith.constant 9.99999974E-6 : f32
    %301 = vector.broadcast %cst_84 : f32 to vector<16x1xf32>
    %302 = arith.addf %298, %301 : vector<16x1xf32>
    %303 = math.rsqrt %302 : vector<16x1xf32>
    %304 = vector.broadcast %303 : vector<16x1xf32> to vector<16x32xf32>
    %305 = arith.mulf %300, %304 : vector<16x32xf32>
    %306 = vector.broadcast %208 : vector<1x32xf32> to vector<16x32xf32>
    %307 = arith.mulf %305, %306 : vector<16x32xf32>
    %308 = vector.broadcast %209 : vector<1x32xf32> to vector<16x32xf32>
    %309 = arith.addf %307, %308 : vector<16x32xf32>
    %cst_85 = arith.constant dense<0.000000e+00> : vector<16x128xf32>
    %310 = tpu.matmul %309, %216, %cst_85 {dimension_numbers = #tpu.dot_dimension_numbers<[1], [0], [0], [1], [0, 0, 1, 1], [], []>} : vector<16x32xf32>, vector<32x128xf32>, vector<16x128xf32> -> vector<16x128xf32>
    %311 = vector.broadcast %213 : vector<1x128xf32> to vector<16x128xf32>
    %312 = arith.addf %310, %311 : vector<16x128xf32>
    %cst_86 = arith.constant 0.707106769 : f32
    %313 = vector.broadcast %cst_86 : f32 to vector<16x128xf32>
    %314 = arith.mulf %312, %313 : vector<16x128xf32>
    %315 = math.absf %314 : vector<16x128xf32>
    %cst_87 = arith.constant 0.327591091 : f32
    %316 = vector.broadcast %cst_87 : f32 to vector<16x128xf32>
    %317 = arith.mulf %316, %315 : vector<16x128xf32>
    %cst_88 = arith.constant 1.000000e+00 : f32
    %318 = vector.broadcast %cst_88 : f32 to vector<16x128xf32>
    %319 = arith.addf %318, %317 : vector<16x128xf32>
    %cst_89 = arith.constant 1.000000e+00 : f32
    %320 = vector.broadcast %cst_89 : f32 to vector<16x128xf32>
    %321 = arith.divf %320, %319 : vector<16x128xf32>
    %cst_90 = arith.constant 1.06140542 : f32
    %322 = vector.broadcast %cst_90 : f32 to vector<16x128xf32>
    %323 = arith.mulf %322, %321 : vector<16x128xf32>
    %cst_91 = arith.constant 1.45315206 : f32
    %324 = vector.broadcast %cst_91 : f32 to vector<16x128xf32>
    %325 = arith.subf %323, %324 : vector<16x128xf32>
    %326 = arith.mulf %325, %321 : vector<16x128xf32>
    %cst_92 = arith.constant 1.42141378 : f32
    %327 = vector.broadcast %cst_92 : f32 to vector<16x128xf32>
    %328 = arith.addf %326, %327 : vector<16x128xf32>
    %329 = arith.mulf %328, %321 : vector<16x128xf32>
    %cst_93 = arith.constant 0.284496725 : f32
    %330 = vector.broadcast %cst_93 : f32 to vector<16x128xf32>
    %331 = arith.subf %329, %330 : vector<16x128xf32>
    %332 = arith.mulf %331, %321 : vector<16x128xf32>
    %cst_94 = arith.constant 0.254829586 : f32
    %333 = vector.broadcast %cst_94 : f32 to vector<16x128xf32>
    %334 = arith.addf %332, %333 : vector<16x128xf32>
    %335 = arith.mulf %334, %321 : vector<16x128xf32>
    %cst_95 = arith.constant 0.000000e+00 : f32
    %336 = vector.broadcast %cst_95 : f32 to vector<16x128xf32>
    %337 = arith.subf %336, %315 : vector<16x128xf32>
    %338 = arith.mulf %337, %315 : vector<16x128xf32>
    %339 = math.exp %338 : vector<16x128xf32>
    %340 = arith.mulf %335, %339 : vector<16x128xf32>
    %cst_96 = arith.constant 1.000000e+00 : f32
    %341 = vector.broadcast %cst_96 : f32 to vector<16x128xf32>
    %342 = arith.subf %341, %340 : vector<16x128xf32>
    %cst_97 = arith.constant 0.000000e+00 : f32
    %343 = vector.broadcast %cst_97 : f32 to vector<16x128xf32>
    %344 = arith.cmpf oge, %314, %343 : vector<16x128xf32>
    %cst_98 = arith.constant 0.000000e+00 : f32
    %345 = vector.broadcast %cst_98 : f32 to vector<16x128xf32>
    %346 = arith.subf %345, %342 : vector<16x128xf32>
    %347 = arith.select %344, %342, %346 : vector<16x128xi1>, vector<16x128xf32>
    %cst_99 = arith.constant 5.000000e-01 : f32
    %348 = vector.broadcast %cst_99 : f32 to vector<16x128xf32>
    %349 = arith.mulf %348, %312 : vector<16x128xf32>
    %cst_100 = arith.constant 1.000000e+00 : f32
    %350 = vector.broadcast %cst_100 : f32 to vector<16x128xf32>
    %351 = arith.addf %350, %347 : vector<16x128xf32>
    %352 = arith.mulf %349, %351 : vector<16x128xf32>
    %cst_101 = arith.constant dense<0.000000e+00> : vector<16x32xf32>
    %353 = tpu.matmul %352, %217, %cst_101 {dimension_numbers = #tpu.dot_dimension_numbers<[1], [0], [0], [1], [0, 0, 1, 1], [], []>} : vector<16x128xf32>, vector<128x32xf32>, vector<16x32xf32> -> vector<16x32xf32>
    %354 = arith.addf %285, %353 : vector<16x32xf32>
    %355 = vector.broadcast %211 : vector<1x32xf32> to vector<16x32xf32>
    %356 = arith.addf %354, %355 : vector<16x32xf32>
    %c512 = arith.constant 512 : index
    %c0_102 = arith.constant 0 : index
    %357 = vector.load %arg1[%c512, %c0_102] : memref<648x128xf32, #tpu.memory_space<vmem>>, vector<8x128xf32>
    %358 = vector.extract_strided_slice %357 {offsets = [0, 0], sizes = [1, 32], strides = [1, 1]} : vector<8x128xf32> to vector<1x32xf32>
    %359 = vector.extract_strided_slice %357 {offsets = [1, 0], sizes = [1, 32], strides = [1, 1]} : vector<8x128xf32> to vector<1x32xf32>
    %360 = vector.extract_strided_slice %357 {offsets = [2, 0], sizes = [1, 96], strides = [1, 1]} : vector<8x128xf32> to vector<1x96xf32>
    %361 = vector.extract_strided_slice %357 {offsets = [3, 0], sizes = [1, 96], strides = [1, 1]} : vector<8x128xf32> to vector<1x96xf32>
    %cst_103 = arith.constant dense<0.000000e+00> : vector<16xf32>
    %362 = vector.multi_reduction <add>, %356, %cst_103 [1] : vector<16x32xf32> to vector<16xf32>
    %363 = vector.shape_cast %362 : vector<16xf32> to vector<16x1xf32>
    %cst_104 = arith.constant 3.200000e+01 : f32
    %364 = vector.broadcast %cst_104 : f32 to vector<16x1xf32>
    %365 = arith.divf %363, %364 : vector<16x1xf32>
    %366 = vector.broadcast %365 : vector<16x1xf32> to vector<16x32xf32>
    %367 = arith.subf %356, %366 : vector<16x32xf32>
    %368 = vector.broadcast %365 : vector<16x1xf32> to vector<16x32xf32>
    %369 = arith.subf %356, %368 : vector<16x32xf32>
    %370 = arith.mulf %367, %369 : vector<16x32xf32>
    %cst_105 = arith.constant dense<0.000000e+00> : vector<16xf32>
    %371 = vector.multi_reduction <add>, %370, %cst_105 [1] : vector<16x32xf32> to vector<16xf32>
    %372 = vector.shape_cast %371 : vector<16xf32> to vector<16x1xf32>
    %cst_106 = arith.constant 3.200000e+01 : f32
    %373 = vector.broadcast %cst_106 : f32 to vector<16x1xf32>
    %374 = arith.divf %372, %373 : vector<16x1xf32>
    %375 = vector.broadcast %365 : vector<16x1xf32> to vector<16x32xf32>
    %376 = arith.subf %356, %375 : vector<16x32xf32>
    %cst_107 = arith.constant 9.99999974E-6 : f32
    %377 = vector.broadcast %cst_107 : f32 to vector<16x1xf32>
    %378 = arith.addf %374, %377 : vector<16x1xf32>
    %379 = math.rsqrt %378 : vector<16x1xf32>
    %380 = vector.broadcast %379 : vector<16x1xf32> to vector<16x32xf32>
    %381 = arith.mulf %376, %380 : vector<16x32xf32>
    %382 = vector.broadcast %358 : vector<1x32xf32> to vector<16x32xf32>
    %383 = arith.mulf %381, %382 : vector<16x32xf32>
    %384 = vector.broadcast %359 : vector<1x32xf32> to vector<16x32xf32>
    %385 = arith.addf %383, %384 : vector<16x32xf32>
    %c520 = arith.constant 520 : index
    %c0_108 = arith.constant 0 : index
    %386 = vector.load %arg1[%c520, %c0_108] : memref<648x128xf32, #tpu.memory_space<vmem>>, vector<32x96xf32>
    %cst_109 = arith.constant dense<0.000000e+00> : vector<16x96xf32>
    %387 = tpu.matmul %385, %386, %cst_109 {dimension_numbers = #tpu.dot_dimension_numbers<[1], [0], [0], [1], [0, 0, 1, 1], [], []>} : vector<16x32xf32>, vector<32x96xf32>, vector<16x96xf32> -> vector<16x96xf32>
    %388 = vector.broadcast %360 : vector<1x96xf32> to vector<16x96xf32>
    %389 = arith.addf %387, %388 : vector<16x96xf32>
    %cst_110 = arith.constant 0.000000e+00 : f32
    %390 = vector.broadcast %cst_110 : f32 to vector<16x96xf32>
    %391 = arith.maximumf %389, %390 : vector<16x96xf32>
    %c552 = arith.constant 552 : index
    %c0_111 = arith.constant 0 : index
    %392 = vector.load %arg1[%c552, %c0_111] : memref<648x128xf32, #tpu.memory_space<vmem>>, vector<96x96xf32>
    %cst_112 = arith.constant dense<0.000000e+00> : vector<16x96xf32>
    %393 = tpu.matmul %391, %392, %cst_112 {dimension_numbers = #tpu.dot_dimension_numbers<[1], [0], [0], [1], [0, 0, 1, 1], [], []>} : vector<16x96xf32>, vector<96x96xf32>, vector<16x96xf32> -> vector<16x96xf32>
    %394 = vector.broadcast %361 : vector<1x96xf32> to vector<16x96xf32>
    %395 = arith.addf %393, %394 : vector<16x96xf32>
    %396 = tpu.concatenate %385, %395 in 1 : vector<16x32xf32>, vector<16x96xf32> -> vector<16x128xf32>
    %c0_113 = arith.constant 0 : index
    %c0_114 = arith.constant 0 : index
    %397 = vector.load %arg2[%c0_113, %c0_114] : memref<16x128xf32, #tpu.memory_space<vmem>>, vector<16x128xf32>
    tpu.vector_store %arg2[%c0_113, %c0_114], %396 {strides = array<i32>} : memref<16x128xf32, #tpu.memory_space<vmem>>, vector<16x128xf32>,
    return
  }
}

</mosaic_0001>

<bundles_post_ra>
// kernel: tpu_custom_call.1
= control target key start
LH: loop header
LB: loop body
LE: loop exit
PB: predicated region body
PF: predicated region fallthrough
CT: control target
= control target key end

     0   :  { %7 = vsyncpa [#allocation3], 0  ;;  %s1872_s0 = inlined_call_operand.vmem [shape: s32[16,1], index: 0, kind: input, shape index: {}]   ;;  %s1873_s1 = inlined_call_operand.hbm [shape: f32[648,128], index: 1, kind: input, shape index: {}]   ;;  %s1874_s2 = inlined_call_operand.hbm [shape: f32[16,128], index: 2, kind: output, shape index: {}]  }
   0x1   :  { %8 = vsyncpa [#allocation4], 0  ;;  %s15_s11 = sshll.u32 %s1873_s1, 4  ;;  %s1599_s12 = smov [#allocation2]   ;;  %s16_s11 = int_to_ptr.hbm [resolvable:$true] %s15_s11 }
   0x2   :  { %s17_s13 = sshll.u32 %s1599_s12, 4  ;;  %s1600_s14 = smov 128   ;;  %s18_s13 = int_to_ptr.vmem [resolvable:$true] %s17_s13 }
   0x3   :  { %s1601_s15 = smov 8  }
   0x4   :  { %23 = dma.hbm_to_vmem [thread:$0]  %s16_s11, 10368, %s18_s13, [#allocation3], %s1600_s14, %s1600_s14, %s1601_s15  }
   0x5   :  { %1595 = dma.done.wait [#allocation3], 10368  }
   0x6   :  { %1596 = vsyncadd [#allocation3], 4294956928  ;;  %v30_v0 = vlaneseq  ;;  %v1602_v1 = vmov 0   ;;  %v28_v9 = vld [vmem:[%s1872_s0] sm:$0xff]  ;;  %v108_v10 = vld [vmem:[#allocation2 + $0x18] sm:$0xff]  ;;  %vm109_vm4 = vcmask 261120  }
   0x7   :  { %1456 = vset.pattern.permute.xlu0 %v1602_v1  ;;  %v83_v11 = vadd.s32 16, %v28_v9  ;;  %128 = vmatpush.msra.mxu0 %v108_v10  ;;  %v107_v12 = vld [vmem:[#allocation2 + $0x10] sm:$0xff]  ;;  %v29_v13 = vld [vmem:[%s1872_s0 + $0x8] sm:$0xff]  ;;  %v105_v19 = vld [vmem:[#allocation2] sm:$0xff]  ;;  %v1603_v21 = vmov 0.0   ;;  %v1604_v30 = vmov 32.0  }
   0x8   :  { %v31_v2 = vshrl.u32 %v30_v0, 7  ;;  %v90_v5 = vand.u32 127, %v30_v0  ;;  %1438 = vmatpush.msra.mxu3 %v108_v10  ;;  %v84_v16 = vadd.s32 16, %v29_v13  ;;  %v106_v18 = vld [vmem:[#allocation2 + $0x8] sm:$0xff]  ;;  %1477 = vrcp.f32 %v1604_v30  ;;  %v145_v47 = vld [vmem:[#allocation2 + $0x50] sm:$0xff]  ;;  %v143_v49 = vld [vmem:[#allocation2 + $0x40] sm:$0xff] }
   0x9   :  { %129 = vmatpush.msra.mxu0 %v107_v12  ;;  %246 = vmatpush.msra.mxu1 %v145_v47  ;;  %v144_v48 = vld [vmem:[#allocation2 + $0x48] sm:$0xff]  ;;  %v142_v50 = vld [vmem:[#allocation2 + $0x38] sm:$0xff]  ;;  %v1661_v62 = vld [vmem:[#allocation2 + $0x30] sm:$0xff]  ;;  %s1605_s0 = smov 96   ;;  %s1606_s19 = smov 64  }
   0xa   :  { %v37_v3 = vand.u32 7, %v31_v2  ;;  %v32_v4 = vadd.s32 8, %v31_v2  ;;  %1439 = vmatpush.msra.mxu3 %v107_v12  ;;  %v221_v0 = vperm.slane %v1661_v62, 0  ;;  %s1607_s20 = smov 112   ;;  %s1608_s21 = smov 80  }
   0xb   :  { %130 = vmatpush.msra.mxu0 %v106_v18  ;;  %247 = vmatpush.msra.mxu1 %v144_v48  ;;  %s1609_s22 = smov 48   ;;  %s1610_s23 = smov 16  }
   0xc   :  { %v61_v6 = vand.u32 3, %v37_v3  ;;  %v44_v7 = vand.u32 7, %v32_v4  ;;  %v87_v8 = vadd.s32 20, %v37_v3  ;;  %1440 = vmatpush.msra.mxu3 %v106_v18  ;;  %v224_v3 = vperm.slane %v1661_v62, 1  ;;  %s1611_s24 = smov 32   ;;  %s1612_s25 = smov [#allocation5]  }
   0xd   :  { %131 = vmatpush.msra.mxu0 %v105_v19  ;;  %248 = vmatpush.msra.mxu1 %v143_v49  ;;  %s1373_s26 = sshll.u32 %s1612_s25, 4  ;;  %s1375_s29 = sshll.u32 %s1874_s2, 4  ;;  %s1374_s26 = int_to_ptr.vmem [resolvable:$true] %s1373_s26  ;;  %s1376_s29 = int_to_ptr.hbm [resolvable:$true] %s1375_s29 }
   0xe   :  { %vm81_vm0 = vcmp.eq.s32.totalorder %v61_v6, 3  ;;  %v68_v14 = vand.u32 3, %v44_v7  ;;  %vm99_vm1 = vcmp.eq.s32.totalorder %v90_v5, %v87_v8  ;;  %1441 = vmatpush.msra.mxu3 %v105_v19  ;;  %v88_v23 = vadd.s32 20, %v44_v7  ;;  %v1478_v31 = vpop.eup %1477 }
   0xf   :  { %v85_v15 = vsel %vm81_vm0, %v83_v11, %v28_v9  ;;  %v177_v32 = vmul.f32 32.0, %v1478_v31  ;;  %vm181_vm9 = vweird.f32 %v1478_v31  ;;  %249 = vmatpush.msra.mxu1 %v142_v50  ;;  %vm263_vm0 = vcmask 130048  }
  0x10   :  { %92 = vperm.xlu0 %1456, %v85_v15   ;;  %vm82_vm2 = vcmp.eq.s32.totalorder %v68_v14, 3  ;;  %vm100_vm6 = vcmp.eq.s32.totalorder %v90_v5, %v88_v23 }
  0x11   :  { %v86_v17 = vsel %vm82_vm2, %v84_v16, %v29_v13  ;;  %v178_v33 = vsub.f32 1.0, %v177_v32  ;;  %v227_v16 = vperm.slane %v1661_v62, 6 }
  0x13   :  { %v179_v34 = vmul.f32 %v1478_v31, %v178_v33 }
  0x15   :  { %v180_v35 = vadd.f32 %v1478_v31, %v179_v34 }
  0x17   :  { %v1651_v36 = vsel %vm181_vm9, %v1478_v31, %v180_v35  ;;  %v1678_v31 = vld [vmem:[#allocation2 + $0x28] sm:$0xff] }
  0x18   :  { %95 = vperm.xlu0 %1456, %v86_v17  }
  0x82   :  { %v93_v20 = vpop.permute.xlu0 %92 }
  0x83   :  { %vm97_vm3 = vcmp.eq.s32.totalorder %v90_v5, %v93_v20 }
  0x84   :  { %vm101_vm5 = vmor %vm97_vm3, %vm99_vm1 }
  0x85   :  { %v103_v22 = vsel %vm101_vm5, 1.0, %v1603_v21 }
  0x86   :  { %1388 = vmatmul.msk.f32.vlgmr.msra.gmra.mxu0 %vm109_vm4, %v103_v22 }
  0x8a   :  { %v96_v24 = vpop.permute.xlu0 %95 }
  0x8b   :  { %vm98_vm7 = vcmp.eq.s32.totalorder %v90_v5, %v96_v24  ;;  %v1674_v24 = vld [vmem:[#allocation2 + $0x20] sm:$0xff] }
  0x8c   :  { %vm102_vm8 = vmor %vm98_vm7, %vm100_vm6 }
  0x8d   :  { %v104_v25 = vsel %vm102_vm8, 1.0, %v1603_v21 }
  0x8e   :  { %1389 = vmatmul.msk.f32.vlgmr.msra.gmra.mxu3 %vm109_vm4, %v104_v25 }
 0x103   :  { %v1643_v26 = vpop.f32.mrf.mxu0 }
 0x104   :  { %v170_v27 = vsel %vm109_vm4, %v1643_v26, 0.0 }
 0x105   :  { %171 = vadd.xlane.f32.xlu1 %v170_v27 }
 0x111   :  { %v1647_v28 = vpop.f32.mrf.mxu3 }
 0x112   :  { %v173_v29 = vsel %vm109_vm4, %v1647_v28, 0.0 }
 0x113   :  { %174 = vadd.xlane.f32.xlu1 %v173_v29 }
 0x178   :  { %v172_v37 = vpop.xlane.xlu1 %171 }
 0x179   :  { %v183_v38 = vmul.f32 %v1651_v36, %v172_v37 }
 0x17b   :  { %v185_v39 = vsub.f32 %v1643_v26, %v183_v38 }
 0x17d   :  { %v187_v40 = vmul.f32 %v185_v39, %v185_v39 }
 0x17f   :  { %v189_v41 = vsel %vm109_vm4, %v187_v40, 0.0 }
 0x180   :  { %190 = vadd.xlane.f32.xlu2 %v189_v41 }
 0x186   :  { %v175_v42 = vpop.xlane.xlu1 %174 }
 0x187   :  { %v184_v43 = vmul.f32 %v1651_v36, %v175_v42 }
 0x189   :  { %v186_v44 = vsub.f32 %v1647_v28, %v184_v43 }
 0x18b   :  { %v188_v45 = vmul.f32 %v186_v44, %v186_v44 }
 0x18d   :  { %v192_v46 = vsel %vm109_vm4, %v188_v45, 0.0 }
 0x18e   :  { %193 = vadd.xlane.f32.xlu2 %v192_v46 }
 0x1f3   :  { %v191_v51 = vpop.xlane.xlu2 %190 }
 0x1f4   :  { %v195_v52 = vmul.f32 %v191_v51, %v1651_v36 }
 0x1f6   :  { %v197_v53 = vadd.f32 1e-05, %v195_v52 }
 0x1f8   :  { %1479 = vrsqrt.f32 %v197_v53  ;;  %vm205_vm11 = vweird.f32 %v197_v53 }
 0x1fe   :  { %v1480_v54 = vpop.eup %1479 }
 0x1ff   :  { %v200_v55 = vmul.f32 %v1480_v54, %v197_v53  ;;  %vm206_vm10 = vweird.f32 %v1480_v54 }
 0x200   :  { %vm207_vm12 = vmor %vm205_vm11, %vm206_vm10 }
 0x201   :  { %v201_v56 = vmul.f32 %v1480_v54, %v200_v55  ;;  %v194_v57 = vpop.xlane.xlu2 %193 }
 0x202   :  { %v196_v58 = vmul.f32 %v194_v57, %v1651_v36 }
 0x203   :  { %v202_v59 = vmul.f32 0.5, %v201_v56 }
 0x204   :  { %v198_v60 = vadd.f32 1e-05, %v196_v58 }
 0x205   :  { %v203_v61 = vsub.f32 1.5, %v202_v59 }
 0x206   :  { %1481 = vrsqrt.f32 %v198_v60  ;;  %vm215_vm14 = vweird.f32 %v198_v60 }
 0x207   :  { %v204_v63 = vmul.f32 %v1480_v54, %v203_v61 }
 0x209   :  { %v208_v1 = vsel %vm207_vm12, %v1480_v54, %v204_v63 }
 0x20a   :  { %v219_v2 = vmul.f32 %v208_v1, %v185_v39 }
 0x20c   :  { %v1482_v4 = vpop.eup %1481  ;;  %v222_v5 = vmul.f32 %v221_v0, %v219_v2 }
 0x20d   :  { %v210_v6 = vmul.f32 %v1482_v4, %v198_v60  ;;  %vm216_vm13 = vweird.f32 %v1482_v4 }
 0x20e   :  { %v225_v7 = vadd.f32 %v224_v3, %v222_v5  ;;  %vm217_vm15 = vmor %vm215_vm14, %vm216_vm13 }
 0x20f   :  { %v211_v8 = vmul.f32 %v1482_v4, %v210_v6 }
 0x210   :  { %1390 = vmatmul.msk.f32.vlgmr.msra.gmra.mxu1 %vm109_vm4, %v225_v7 }
 0x211   :  { %v212_v9 = vmul.f32 0.5, %v211_v8 }
 0x213   :  { %v213_v10 = vsub.f32 1.5, %v212_v9 }
 0x215   :  { %v214_v11 = vmul.f32 %v1482_v4, %v213_v10 }
 0x217   :  { %v218_v12 = vsel %vm217_vm15, %v1482_v4, %v214_v11 }
 0x218   :  { %v220_v13 = vmul.f32 %v218_v12, %v186_v44 }
 0x21a   :  { %v223_v14 = vmul.f32 %v221_v0, %v220_v13 }
 0x21c   :  { %v226_v15 = vadd.f32 %v224_v3, %v223_v14 }
 0x21e   :  { %1391 = vmatmul.msk.f32.gmra.mxu1 %vm109_vm4, %v226_v15 }
 0x28d   :  { %v251_v17 = vpop.f32.mrf.mxu1 }
 0x28e   :  { %v252_v18 = vadd.f32 %v251_v17, %v227_v16 }
 0x290   :  { %259 = vrot.lane.b32.xlu1 %v252_v18, %s1605_s0 }
 0x29b   :  { %v254_v19 = vpop.f32.mrf.mxu1 }
 0x29c   :  { %v255_v20 = vadd.f32 %v254_v19, %v227_v16 }
 0x29e   :  { %261 = vrot.lane.b32.xlu0 %v255_v20, %s1605_s0  ;;  %v1457_v35 = vpack.i.bf16 %v252_v18, %v255_v20 }
 0x302   :  { %v260_v22 = vpop.permute.xlu1 %259 }
 0x310   :  { %v262_v21 = vpop.permute.xlu0 %261 }
 0x311   :  { %1392 = vmatpush.xpose.msk.msra.mxu2 %vm263_vm0, %v262_v21 }
 0x315   :  { %1393 = vmatpush.xpose.msk.msra.mxu2 %vm263_vm0, %v260_v22 }
 0x318   :  { %1394 = vmatmul.msk.f32.vlgmr.msra.gmra.mxu2 %vm263_vm0, %v252_v18 }
 0x320   :  { %1395 = vmatmul.msk.f32.gmra.mxu2 %vm263_vm0, %v255_v20 }
 0x39b   :  { %v289_v23 = vpop.f32.mrf.mxu2 }
 0x39c   :  { %v295_v25 = vmul.f32 0.25, %v289_v23 }
 0x39e   :  { %v297_v27 = vadd.f32 %v295_v25, %v1674_v24 }
 0x3a0   :  { %v299_v29 = vsel %vm263_vm0, %v297_v27, -inf }
 0x3a1   :  { %300 = vmax.xlane.f32.xlu2 %v299_v29  ;;  %v149_v29 = vld [vmem:[#allocation2 + $0x70] sm:$0xff] }
 0x3a2   :  { %484 = vmatpush.msrb.mxu1 %v149_v29 }
 0x3a3   :  { %v292_v30 = vpop.f32.mrf.mxu2 }
 0x3a4   :  { %v296_v32 = vmul.f32 0.25, %v292_v30  ;;  %v148_v30 = vld [vmem:[#allocation2 + $0x68] sm:$0xff] }
 0x3a5   :  { %485 = vmatpush.msrb.mxu1 %v148_v30  ;;  %v169_v30 = vld [vmem:[#allocation2 + $0x110] sm:$0xff] }
 0x3a6   :  { %v298_v33 = vadd.f32 %v296_v32, %v1678_v31  ;;  %v147_v32 = vld [vmem:[#allocation2 + $0x60] sm:$0xff] }
 0x3a7   :  { %486 = vmatpush.msrb.mxu1 %v147_v32  ;;  %v168_v32 = vld [vmem:[#allocation2 + $0x108] sm:$0xff] }
 0x3a8   :  { %v302_v34 = vsel %vm263_vm0, %v298_v33, -inf }
 0x3a9   :  { %303 = vmax.xlane.f32.xlu0 %v302_v34 }
 0x3b9   :  { %1458 = vrot.lane.b32.xlu2 %v1457_v35, %s1606_s19 }
 0x3bd   :  { %356 = vrot.lane.b32.xlu0 %v252_v18, %s1607_s20 }
 0x414   :  { %v301_v37 = vpop.xlane.xlu2 %300 }
 0x415   :  { %v305_v38 = vsub.f32 %v297_v27, %v301_v37 }
 0x417   :  { %v307_v39 = vmul.f32 1.442695, %v305_v38 }
 0x419   :  { %1483 = vpow2.f32 %v307_v39 }
 0x41c   :  { %v1459_v40 = vpop.permute.xlu2 %1458  ;;  %v304_v41 = vpop.xlane.xlu0 %303 }
 0x41d   :  { %v306_v42 = vsub.f32 %v298_v33, %v304_v41  ;;  %v1460_v43 = vunpack.i.l.bf16 %v1459_v40  ;;  %v1461_v46 = vunpack.i.h.bf16 %v1459_v40  ;;  %v497_v41 = vperm.slane %v1661_v62, 4 }
 0x41f   :  { %v1484_v44 = vpop.eup %1483  ;;  %v309_v45 = vmul.f32 1.442695, %v306_v42  ;;  %347 = vmatpush.msrb.mxu3 %v1460_v43 }
 0x420   :  { %v311_v47 = vsel %vm263_vm0, %v1484_v44, 0.0 }
 0x421   :  { %1485 = vpow2.f32 %v309_v45  ;;  %312 = vadd.xlane.f32.xlu2 %v311_v47  ;;  %348 = vmatpush.msrb.mxu3 %v1461_v46 }
 0x427   :  { %v1486_v48 = vpop.eup %1485 }
 0x428   :  { %v314_v49 = vsel %vm263_vm0, %v1486_v48, 0.0 }
 0x429   :  { %315 = vadd.xlane.f32.xlu1 %v314_v49 }
 0x42f   :  { %v357_v58 = vpop.permute.xlu0 %356 }
 0x439   :  { %362 = vrot.lane.b32.xlu2 %v255_v20, %s1608_s21 }
 0x441   :  { %360 = vrot.lane.b32.xlu2 %v252_v18, %s1608_s21 }
 0x449   :  { %358 = vrot.lane.b32.xlu2 %v255_v20, %s1607_s20 }
 0x494   :  { %v313_v50 = vpop.xlane.xlu2 %312 }
 0x495   :  { %1487 = vrcp.f32 %v313_v50 }
 0x49b   :  { %v1488_v51 = vpop.eup %1487 }
 0x49c   :  { %v363_v52 = vpop.permute.xlu2 %362  ;;  %v316_v53 = vpop.xlane.xlu1 %315  ;;  %v319_v54 = vmul.f32 %v1488_v51, %v1484_v44 }
 0x49d   :  { %1489 = vrcp.f32 %v316_v53  ;;  %1398 = vmatpush.xpose.msk.msra.mxu3 %vm263_vm0, %v363_v52 }
 0x49e   :  { %1396 = vmatmul.msk.f32.vlgmr.msrb.gmra.mxu3 %vm263_vm0, %v319_v54 }
 0x4a3   :  { %v1490_v55 = vpop.eup %1489 }
 0x4a4   :  { %v361_v56 = vpop.permute.xlu2 %360  ;;  %v320_v57 = vmul.f32 %v1490_v55, %v1486_v48 }
 0x4a5   :  { %1399 = vmatpush.xpose.msk.msra.mxu3 %vm263_vm0, %v361_v56 }
 0x4a6   :  { %1397 = vmatmul.msk.f32.gmra.mxu3 %vm263_vm0, %v320_v57 }
 0x4a9   :  { %660 = vmatpush.msrb.mxu3 %v169_v30 }
 0x4ab   :  { %661 = vmatpush.msrb.mxu3 %v168_v32 }
 0x4ac   :  { %v359_v59 = vpop.permute.xlu2 %358 }
 0x4ae   :  { %1400 = vmatmul.msk.f32.vlgmr.msra.gmra.mxu3 %vm263_vm0, %v357_v58  ;;  %v153_v58 = vld [vmem:[#allocation2 + $0x90] sm:$0xff] }
 0x4af   :  { %569 = vmatpush.msrb.mxu2 %v153_v58 }
 0x4b6   :  { %1401 = vmatmul.msk.f32.gmra.mxu3 %vm263_vm0, %v359_v59  ;;  %v152_v59 = vld [vmem:[#allocation2 + $0x88] sm:$0xff] }
 0x4b7   :  { %570 = vmatpush.msrb.mxu2 %v152_v59  ;;  %v155_v59 = vld [vmem:[#allocation2 + $0xa0] sm:$0xff] }
 0x521   :  { %v350_v60 = vpop.f32.mrf.mxu3 }
 0x529   :  { %v353_v61 = vpop.f32.mrf.mxu3 }
 0x531   :  { %v389_v63 = vpop.f32.mrf.mxu3 }
 0x532   :  { %v395_v0 = vmul.f32 0.25, %v389_v63 }
 0x534   :  { %v397_v1 = vadd.f32 %v395_v0, %v1674_v24 }
 0x536   :  { %v399_v2 = vsel %vm263_vm0, %v397_v1, -inf }
 0x537   :  { %400 = vmax.xlane.f32.xlu2 %v399_v2 }
 0x539   :  { %v392_v3 = vpop.f32.mrf.mxu3 }
 0x53a   :  { %v396_v4 = vmul.f32 0.25, %v392_v3 }
 0x53c   :  { %v398_v5 = vadd.f32 %v396_v4, %v1678_v31 }
 0x53e   :  { %v402_v6 = vsel %vm263_vm0, %v398_v5, -inf }
 0x53f   :  { %403 = vmax.xlane.f32.xlu1 %v402_v6 }
 0x558   :  { %1463 = vrot.lane.b32.xlu1 %v1457_v35, %s1609_s22  ;;  %v146_v35 = vld [vmem:[#allocation2 + $0x58] sm:$0xff] }
 0x559   :  { %487 = vmatpush.msrb.mxu1 %v146_v35 }
 0x5aa   :  { %v401_v7 = vpop.xlane.xlu2 %400 }
 0x5ab   :  { %v405_v8 = vsub.f32 %v397_v1, %v401_v7 }
 0x5ad   :  { %v407_v9 = vmul.f32 1.442695, %v405_v8  ;;  %v544_v8 = vperm.slane %v1661_v62, 2 }
 0x5af   :  { %1491 = vpow2.f32 %v407_v9 }
 0x5b2   :  { %v404_v10 = vpop.xlane.xlu1 %403 }
 0x5b3   :  { %v406_v11 = vsub.f32 %v398_v5, %v404_v10 }
 0x5b5   :  { %v1492_v12 = vpop.eup %1491  ;;  %v409_v13 = vmul.f32 1.442695, %v406_v11  ;;  %v547_v11 = vperm.slane %v1661_v62, 3 }
 0x5b6   :  { %v411_v14 = vsel %vm263_vm0, %v1492_v12, 0.0 }
 0x5b7   :  { %1493 = vpow2.f32 %v409_v13  ;;  %412 = vadd.xlane.f32.xlu0 %v411_v14 }
 0x5bd   :  { %v1494_v15 = vpop.eup %1493 }
 0x5be   :  { %v414_v16 = vsel %vm263_vm0, %v1494_v15, 0.0 }
 0x5bf   :  { %415 = vadd.xlane.f32.xlu1 %v414_v16 }
 0x5ca   :  { %v1464_v17 = vpop.permute.xlu1 %1463 }
 0x5cb   :  { %v1465_v18 = vunpack.i.l.bf16 %v1464_v17  ;;  %v1466_v19 = vunpack.i.h.bf16 %v1464_v17 }
 0x5cd   :  { %447 = vmatpush.msrb.mxu0 %v1465_v18 }
 0x5cf   :  { %448 = vmatpush.msrb.mxu0 %v1466_v19 }
 0x62a   :  { %v413_v20 = vpop.xlane.xlu0 %412 }
 0x62b   :  { %1495 = vrcp.f32 %v413_v20 }
 0x631   :  { %v1496_v21 = vpop.eup %1495 }
 0x632   :  { %v416_v22 = vpop.xlane.xlu1 %415  ;;  %v419_v23 = vmul.f32 %v1496_v21, %v1492_v12 }
 0x633   :  { %1497 = vrcp.f32 %v416_v22 }
 0x634   :  { %1402 = vmatmul.msk.f32.vlgmr.msrb.gmra.mxu0 %vm263_vm0, %v419_v23 }
 0x639   :  { %v1498_v25 = vpop.eup %1497 }
 0x63a   :  { %v420_v27 = vmul.f32 %v1498_v25, %v1494_v15 }
 0x63c   :  { %1403 = vmatmul.msk.f32.gmra.mxu0 %vm263_vm0, %v420_v27 }
 0x6b1   :  { %v450_v33 = vpop.f32.mrf.mxu0 }
 0x6b2   :  { %458 = vrot.lane.b32.xlu2 %v450_v33, %s1610_s23  ;;  %v550_v33 = vperm.slane %v1661_v62, 7 }
 0x6b9   :  { %v453_v34 = vpop.f32.mrf.mxu0 }
 0x6ba   :  { %460 = vrot.lane.b32.xlu0 %v453_v34, %s1610_s23  ;;  %v167_v34 = vld [vmem:[#allocation2 + $0x100] sm:$0xff] }
 0x6bb   :  { %662 = vmatpush.msrb.mxu3 %v167_v34 }
 0x70c   :  { %v459_v37 = vpop.permute.xlu2 %458 }
 0x70d   :  { %v464_v38 = vsel %vm263_vm0, %v350_v60, %v459_v37  ;;  %v151_v60 = vld [vmem:[#allocation2 + $0x80] sm:$0xff]  ;;  %v166_v37 = vld [vmem:[#allocation2 + $0xf8] sm:$0xff] }
 0x70e   :  { %1404 = vmatmul.msk.f32.vlgmr.msrb.gmra.mxu1 %vm109_vm4, %v464_v38  ;;  %571 = vmatpush.msrb.mxu2 %v151_v60  ;;  %v154_v60 = vld [vmem:[#allocation2 + $0x98] sm:$0xff] }
 0x70f   :  { %663 = vmatpush.msrb.mxu3 %v166_v37 }
 0x72c   :  { %v461_v39 = vpop.permute.xlu0 %460 }
 0x72d   :  { %v465_v40 = vsel %vm263_vm0, %v353_v61, %v461_v39  ;;  %v150_v61 = vld [vmem:[#allocation2 + $0x78] sm:$0xff]  ;;  %v165_v39 = vld [vmem:[#allocation2 + $0xf0] sm:$0xff] }
 0x72e   :  { %1405 = vmatmul.msk.f32.gmra.mxu1 %vm109_vm4, %v465_v40  ;;  %572 = vmatpush.msrb.mxu2 %v150_v61 }
 0x72f   :  { %664 = vmatpush.msrb.mxu3 %v165_v39 }
 0x78b   :  { %v489_v42 = vpop.f32.mrf.mxu1 }
 0x78c   :  { %v495_v43 = vadd.f32 %v489_v42, %v1643_v26 }
 0x78e   :  { %v1712_v44 = vadd.f32 %v497_v41, %v495_v43  ;;  %v163_v43 = vld [vmem:[#allocation2 + $0xe0] sm:$0xff] }
 0x790   :  { %v500_v45 = vsel %vm109_vm4, %v1712_v44, 0.0 }
 0x791   :  { %501 = vadd.xlane.f32.xlu2 %v500_v45 }
 0x7ab   :  { %v492_v46 = vpop.f32.mrf.mxu1 }
 0x7ac   :  { %v496_v47 = vadd.f32 %v492_v46, %v1647_v28  ;;  %v162_v46 = vld [vmem:[#allocation2 + $0xd8] sm:$0xff] }
 0x7ae   :  { %v1717_v48 = vadd.f32 %v497_v41, %v496_v47  ;;  %v164_v41 = vld [vmem:[#allocation2 + $0xe8] sm:$0xff] }
 0x7af   :  { %665 = vmatpush.msrb.mxu3 %v164_v41 }
 0x7b0   :  { %v503_v49 = vsel %vm109_vm4, %v1717_v48, 0.0 }
 0x7b1   :  { %504 = vadd.xlane.f32.xlu0 %v503_v49  ;;  %666 = vmatpush.msrb.mxu3 %v163_v43  ;;  %v161_v49 = vld [vmem:[#allocation2 + $0xd0] sm:$0xff] }
 0x7b3   :  { %667 = vmatpush.msrb.mxu3 %v162_v46 }
 0x7b5   :  { %668 = vmatpush.msrb.mxu3 %v161_v49 }
 0x804   :  { %v502_v50 = vpop.xlane.xlu2 %501 }
 0x805   :  { %v506_v51 = vmul.f32 %v502_v50, %v1651_v36  ;;  %v160_v50 = vld [vmem:[#allocation2 + $0xc8] sm:$0xff] }
 0x806   :  { %669 = vmatpush.msrb.mxu3 %v160_v50 }
 0x807   :  { %v508_v26 = vsub.f32 %v1712_v44, %v506_v51  ;;  %v159_v51 = vld [vmem:[#allocation2 + $0xc0] sm:$0xff] }
 0x808   :  { %670 = vmatpush.msrb.mxu3 %v159_v51 }
 0x809   :  { %v510_v52 = vmul.f32 %v508_v26, %v508_v26 }
 0x80b   :  { %v512_v53 = vsel %vm109_vm4, %v510_v52, 0.0 }
 0x80c   :  { %513 = vadd.xlane.f32.xlu1 %v512_v53 }
 0x824   :  { %v505_v54 = vpop.xlane.xlu0 %504 }
 0x825   :  { %v507_v55 = vmul.f32 %v505_v54, %v1651_v36  ;;  %v157_v54 = vld [vmem:[#allocation2 + $0xb0] sm:$0xff] }
 0x827   :  { %v509_v28 = vsub.f32 %v1717_v48, %v507_v55 }
 0x829   :  { %v511_v56 = vmul.f32 %v509_v28, %v509_v28 }
 0x82b   :  { %v515_v57 = vsel %vm109_vm4, %v511_v56, 0.0 }
 0x82c   :  { %516 = vadd.xlane.f32.xlu1 %v515_v57 }
 0x87f   :  { %v514_v63 = vpop.xlane.xlu1 %513 }
 0x880   :  { %v518_v0 = vmul.f32 %v514_v63, %v1651_v36 }
 0x882   :  { %v520_v1 = vadd.f32 1e-05, %v518_v0 }
 0x884   :  { %1499 = vrsqrt.f32 %v520_v1  ;;  %vm528_vm2 = vweird.f32 %v520_v1 }
 0x88a   :  { %v1500_v2 = vpop.eup %1499 }
 0x88b   :  { %v523_v3 = vmul.f32 %v1500_v2, %v520_v1  ;;  %vm529_vm1 = vweird.f32 %v1500_v2 }
 0x88c   :  { %vm530_vm3 = vmor %vm528_vm2, %vm529_vm1 }
 0x88d   :  { %v524_v4 = vmul.f32 %v1500_v2, %v523_v3 }
 0x88f   :  { %v525_v5 = vmul.f32 0.5, %v524_v4 }
 0x891   :  { %v526_v6 = vsub.f32 1.5, %v525_v5 }
 0x893   :  { %v527_v7 = vmul.f32 %v1500_v2, %v526_v6 }
 0x895   :  { %v531_v9 = vsel %vm530_vm3, %v1500_v2, %v527_v7 }
 0x896   :  { %v542_v10 = vmul.f32 %v531_v9, %v508_v26  ;;  %v158_v26 = vld [vmem:[#allocation2 + $0xb8] sm:$0xff] }
 0x897   :  { %671 = vmatpush.msrb.mxu3 %v158_v26 }
 0x898   :  { %v545_v12 = vmul.f32 %v544_v8, %v542_v10 }
 0x899   :  { %672 = vmatpush.msrb.mxu3 %v157_v54 }
 0x89a   :  { %v548_v13 = vadd.f32 %v547_v11, %v545_v12 }
 0x89c   :  { %1406 = vmatmul.msk.f32.vlgmr.msrb.gmra.mxu2 %vm109_vm4, %v548_v13 }
 0x89f   :  { %v517_v14 = vpop.xlane.xlu1 %516 }
 0x8a0   :  { %v519_v15 = vmul.f32 %v517_v14, %v1651_v36 }
 0x8a2   :  { %v521_v16 = vadd.f32 1e-05, %v519_v15 }
 0x8a4   :  { %1501 = vrsqrt.f32 %v521_v16  ;;  %vm538_vm6 = vweird.f32 %v521_v16 }
 0x8aa   :  { %v1502_v17 = vpop.eup %1501 }
 0x8ab   :  { %v533_v18 = vmul.f32 %v1502_v17, %v521_v16  ;;  %vm539_vm5 = vweird.f32 %v1502_v17 }
 0x8ac   :  { %vm540_vm7 = vmor %vm538_vm6, %vm539_vm5 }
 0x8ad   :  { %v534_v19 = vmul.f32 %v1502_v17, %v533_v18 }
 0x8af   :  { %v535_v20 = vmul.f32 0.5, %v534_v19 }
 0x8b1   :  { %v536_v21 = vsub.f32 1.5, %v535_v20 }
 0x8b3   :  { %v537_v22 = vmul.f32 %v1502_v17, %v536_v21 }
 0x8b5   :  { %v541_v23 = vsel %vm540_vm7, %v1502_v17, %v537_v22 }
 0x8b6   :  { %v543_v25 = vmul.f32 %v541_v23, %v509_v28  ;;  %v156_v28 = vld [vmem:[#allocation2 + $0xa8] sm:$0xff] }
 0x8b7   :  { %673 = vmatpush.msrb.mxu3 %v156_v28 }
 0x8b8   :  { %v546_v27 = vmul.f32 %v544_v8, %v543_v25 }
 0x8b9   :  { %674 = vmatpush.msrb.mxu3 %v155_v59 }
 0x8ba   :  { %v549_v29 = vadd.f32 %v547_v11, %v546_v27 }
 0x8bb   :  { %675 = vmatpush.msrb.mxu3 %v154_v60 }
 0x8bc   :  { %1407 = vmatmul.msk.f32.gmra.mxu2 %vm109_vm4, %v549_v29 }
 0x91f   :  { %v574_v35 = vpop.f32.mrf.mxu2 }
 0x920   :  { %v1734_v38 = vadd.f32 %v574_v35, %v550_v33 }
 0x922   :  { %v1737_v40 = vmul.f32 0.70710677, %v1734_v38  ;;  %v654_v32 = vmul.f32 0.5, %v1734_v38 }
 0x924   :  { %v582_v42 = vand.u32 2147483647, %v1737_v40  ;;  %vm648_vm12 = vcmp.ge.f32.partialorder %v1737_v40, 0.0 }
 0x926   :  { %v584_v45 = vmul.f32 0.3275911, %v582_v42  ;;  %v636_v2 = vsub.f32 0.0, %v582_v42 }
 0x928   :  { %v586_v47 = vadd.f32 1.0, %v584_v45  ;;  %v638_v5 = vmul.f32 %v636_v2, %v582_v42 }
 0x92a   :  { %1503 = vrcp.f32 %v586_v47  ;;  %v599_v56 = vand.u32 2147483648, %v586_v47  ;;  %v597_v58 = vand.u32 2147483647, %v586_v47  ;;  %vm593_vm9 = vweird.f32 %v586_v47 }
 0x92b   :  { %v640_v10 = vmul.f32 1.442695, %v638_v5 }
 0x92c   :  { %v600_v63 = vor.u32 1.1754944e-38, %v599_v56  ;;  %vm598_vm11 = vcmp.eq.f32.partialorder %v597_v58, 8.507059e+37 }
 0x92d   :  { %1505 = vpow2.f32 %v640_v10 }
 0x930   :  { %v1504_v52 = vpop.eup %1503 }
 0x931   :  { %v589_v53 = vmul.f32 %v1504_v52, %v586_v47  ;;  %vm594_vm8 = vweird.f32 %v1504_v52 }
 0x932   :  { %vm595_vm10 = vmor %vm593_vm9, %vm594_vm8 }
 0x933   :  { %v590_v55 = vsub.f32 1.0, %v589_v53  ;;  %v1506_v20 = vpop.eup %1505 }
 0x935   :  { %v591_v57 = vmul.f32 %v1504_v52, %v590_v55 }
 0x937   :  { %v592_v61 = vadd.f32 %v1504_v52, %v591_v57 }
 0x939   :  { %v596_v0 = vsel %vm595_vm10, %v1504_v52, %v592_v61 }
 0x93a   :  { %v601_v1 = vsel %vm598_vm11, %v600_v63, %v596_v0  ;;  %v685_v0 = vperm.slane %v1661_v62, 5 }
 0x93b   :  { %v618_v3 = vmul.f32 1.0614054, %v601_v1 }
 0x93d   :  { %v1408_v4 = vadd.f32 -1.4531521, %v618_v3 }
 0x93f   :  { %v622_v6 = vmul.f32 %v1408_v4, %v601_v1  ;;  %v577_v7 = vpop.f32.mrf.mxu2 }
 0x940   :  { %v578_v8 = vadd.f32 %v577_v7, %v550_v33 }
 0x941   :  { %v624_v9 = vadd.f32 1.4214138, %v622_v6 }
 0x942   :  { %v581_v11 = vmul.f32 0.70710677, %v578_v8  ;;  %v655_v60 = vmul.f32 0.5, %v578_v8 }
 0x943   :  { %v626_v12 = vmul.f32 %v624_v9, %v601_v1 }
 0x944   :  { %v583_v13 = vand.u32 2147483647, %v581_v11  ;;  %vm649_vm2 = vcmp.ge.f32.partialorder %v581_v11, 0.0 }
 0x945   :  { %v1410_v14 = vadd.f32 -0.28449672, %v626_v12 }
 0x946   :  { %v585_v15 = vmul.f32 0.3275911, %v583_v13  ;;  %v637_v45 = vsub.f32 0.0, %v583_v13 }
 0x947   :  { %v630_v16 = vmul.f32 %v1410_v14, %v601_v1 }
 0x948   :  { %v587_v17 = vadd.f32 1.0, %v585_v15  ;;  %v639_v49 = vmul.f32 %v637_v45, %v583_v13 }
 0x949   :  { %v632_v18 = vadd.f32 0.2548296, %v630_v16  ;;  %v692_v16 = vld [vmem:[#allocation2 + $0x138] sm:$0xff] }
 0x94a   :  { %1507 = vrcp.f32 %v587_v17  ;;  %v614_v34 = vand.u32 2147483648, %v587_v17  ;;  %v612_v37 = vand.u32 2147483647, %v587_v17  ;;  %vm608_vm14 = vweird.f32 %v587_v17  ;;  %786 = vmatpush.msra.mxu0 %v692_v16 }
 0x94b   :  { %v634_v19 = vmul.f32 %v632_v18, %v601_v1  ;;  %v642_v51 = vmul.f32 1.442695, %v639_v49  ;;  %v690_v18 = vld [vmem:[#allocation2 + $0x128] sm:$0xff] }
 0x94c   :  { %v615_v42 = vor.u32 1.1754944e-38, %v614_v34  ;;  %vm613_vm1 = vcmp.eq.f32.partialorder %v612_v37, 8.507059e+37 }
 0x94d   :  { %v644_v21 = vmul.f32 %v1506_v20, %v634_v19  ;;  %1509 = vpow2.f32 %v642_v51  ;;  %v689_v19 = vld [vmem:[#allocation2 + $0x120] sm:$0xff] }
 0x94f   :  { %v646_v22 = vsub.f32 1.0, %v644_v21 }
 0x950   :  { %v1508_v23 = vpop.eup %1507 }
 0x951   :  { %v650_v25 = vsub.f32 0.0, %v646_v22  ;;  %v604_v27 = vmul.f32 %v1508_v23, %v587_v17  ;;  %vm609_vm13 = vweird.f32 %v1508_v23  ;;  %v691_v17 = vld [vmem:[#allocation2 + $0x130] sm:$0xff] }
 0x952   :  { %vm610_vm15 = vmor %vm608_vm14, %vm609_vm13  ;;  %787 = vmatpush.msra.mxu0 %v691_v17 }
 0x953   :  { %v652_v29 = vsel %vm648_vm12, %v646_v22, %v650_v25  ;;  %v605_v30 = vsub.f32 1.0, %v604_v27  ;;  %v1510_v28 = vpop.eup %1509 }
 0x954   :  { %v656_v33 = vadd.f32 1.0, %v652_v29  ;;  %788 = vmatpush.msra.mxu0 %v690_v18 }
 0x955   :  { %v606_v35 = vmul.f32 %v1508_v23, %v605_v30  ;;  %v1760_v30 = vld [vmem:[#allocation2 + $0x118] sm:$0xff] }
 0x956   :  { %v658_v39 = vmul.f32 %v656_v33, %v654_v32  ;;  %789 = vmatpush.msra.mxu0 %v689_v19  ;;  %v761_v34 = vperm.slane %v1760_v30, 0 }
 0x957   :  { %v607_v41 = vadd.f32 %v1508_v23, %v606_v35 }
 0x958   :  { %676 = vmatmul.f32.vlgmr.msrb.gmra.mxu3 %v658_v39  ;;  %v764_v39 = vperm.slane %v1760_v30, 1 }
 0x959   :  { %v611_v43 = vsel %vm610_vm15, %v1508_v23, %v607_v41 }
 0x95a   :  { %v616_v46 = vsel %vm613_vm1, %v615_v42, %v611_v43 }
 0x95b   :  { %v619_v40 = vmul.f32 1.0614054, %v616_v46 }
 0x95d   :  { %v1409_v47 = vadd.f32 -1.4531521, %v619_v40 }
 0x95f   :  { %v623_v50 = vmul.f32 %v1409_v47, %v616_v46 }
 0x961   :  { %v625_v38 = vadd.f32 1.4214138, %v623_v50 }
 0x963   :  { %v627_v26 = vmul.f32 %v625_v38, %v616_v46 }
 0x965   :  { %v1411_v52 = vadd.f32 -0.28449672, %v627_v26 }
 0x967   :  { %v631_v53 = vmul.f32 %v1411_v52, %v616_v46 }
 0x969   :  { %v633_v54 = vadd.f32 0.2548296, %v631_v53 }
 0x96b   :  { %v635_v55 = vmul.f32 %v633_v54, %v616_v46 }
 0x96d   :  { %v645_v56 = vmul.f32 %v1510_v28, %v635_v55  ;;  %v767_v55 = vperm.slane %v1760_v30, 6 }
 0x96f   :  { %v647_v57 = vsub.f32 1.0, %v645_v56 }
 0x971   :  { %v651_v58 = vsub.f32 0.0, %v647_v57 }
 0x973   :  { %v653_v59 = vsel %vm649_vm2, %v647_v57, %v651_v58 }
 0x974   :  { %v657_v61 = vadd.f32 1.0, %v653_v59 }
 0x976   :  { %v659_v63 = vmul.f32 %v657_v61, %v655_v60 }
 0x978   :  { %679 = vmatmul.f32.gmra.mxu3 %v659_v63 }
 0x9db   :  { %v677_v1 = vpop.f32.mrf.mxu3 }
 0x9dc   :  { %v683_v2 = vadd.f32 %v677_v1, %v1712_v44 }
 0x9de   :  { %v1744_v3 = vadd.f32 %v685_v0, %v683_v2 }
 0x9e0   :  { %v717_v4 = vsel %vm109_vm4, %v1744_v3, 0.0 }
 0x9e1   :  { %718 = vadd.xlane.f32.xlu1 %v717_v4 }
 0x9fb   :  { %v680_v5 = vpop.f32.mrf.mxu3 }
 0x9fc   :  { %v684_v6 = vadd.f32 %v680_v5, %v1717_v48 }
 0x9fe   :  { %v1749_v7 = vadd.f32 %v685_v0, %v684_v6 }
 0xa00   :  { %v720_v8 = vsel %vm109_vm4, %v1749_v7, 0.0 }
 0xa01   :  { %721 = vadd.xlane.f32.xlu1 %v720_v8 }
 0xa54   :  { %v719_v9 = vpop.xlane.xlu1 %718 }
 0xa55   :  { %v723_v62 = vmul.f32 %v719_v9, %v1651_v36 }
 0xa57   :  { %v725_v44 = vsub.f32 %v1744_v3, %v723_v62 }
 0xa59   :  { %v727_v10 = vmul.f32 %v725_v44, %v725_v44 }
 0xa5b   :  { %v729_v11 = vsel %vm109_vm4, %v727_v10, 0.0 }
 0xa5c   :  { %730 = vadd.xlane.f32.xlu2 %v729_v11 }
 0xa74   :  { %v722_v12 = vpop.xlane.xlu1 %721 }
 0xa75   :  { %v724_v13 = vmul.f32 %v722_v12, %v1651_v36 }
 0xa77   :  { %v726_v48 = vsub.f32 %v1749_v7, %v724_v13 }
 0xa79   :  { %v728_v14 = vmul.f32 %v726_v48, %v726_v48 }
 0xa7b   :  { %v732_v15 = vsel %vm109_vm4, %v728_v14, 0.0 }
 0xa7c   :  { %733 = vadd.xlane.f32.xlu0 %v732_v15 }
 0xacf   :  { %v731_v20 = vpop.xlane.xlu2 %730 }
 0xad0   :  { %v735_v21 = vmul.f32 %v731_v20, %v1651_v36 }
 0xad2   :  { %v737_v22 = vadd.f32 1e-05, %v735_v21 }
 0xad4   :  { %1511 = vrsqrt.f32 %v737_v22  ;;  %vm745_vm5 = vweird.f32 %v737_v22 }
 0xada   :  { %v1512_v23 = vpop.eup %1511 }
 0xadb   :  { %v740_v25 = vmul.f32 %v1512_v23, %v737_v22  ;;  %vm746_vm3 = vweird.f32 %v1512_v23 }
 0xadc   :  { %vm747_vm6 = vmor %vm745_vm5, %vm746_vm3 }
 0xadd   :  { %v741_v27 = vmul.f32 %v1512_v23, %v740_v25 }
 0xadf   :  { %v742_v29 = vmul.f32 0.5, %v741_v27 }
 0xae1   :  { %v743_v32 = vsub.f32 1.5, %v742_v29 }
 0xae3   :  { %v744_v33 = vmul.f32 %v1512_v23, %v743_v32 }
 0xae5   :  { %v748_v35 = vsel %vm747_vm6, %v1512_v23, %v744_v33 }
 0xae6   :  { %v759_v37 = vmul.f32 %v748_v35, %v725_v44 }
 0xae8   :  { %v762_v41 = vmul.f32 %v761_v34, %v759_v37 }
 0xaea   :  { %v765_v42 = vadd.f32 %v764_v39, %v762_v41 }
 0xaec   :  { %1412 = vmatmul.msk.f32.vlgmr.msra.gmra.mxu0 %vm109_vm4, %v765_v42 }
 0xaef   :  { %v734_v43 = vpop.xlane.xlu0 %733 }
 0xaf0   :  { %v736_v45 = vmul.f32 %v734_v43, %v1651_v36 }
 0xaf2   :  { %v738_v46 = vadd.f32 1e-05, %v736_v45 }
 0xaf4   :  { %1513 = vrsqrt.f32 %v738_v46  ;;  %vm755_vm8 = vweird.f32 %v738_v46 }
 0xafa   :  { %v1514_v40 = vpop.eup %1513 }
 0xafb   :  { %v750_v47 = vmul.f32 %v1514_v40, %v738_v46  ;;  %vm756_vm7 = vweird.f32 %v1514_v40 }
 0xafc   :  { %vm757_vm9 = vmor %vm755_vm8, %vm756_vm7 }
 0xafd   :  { %v751_v49 = vmul.f32 %v1514_v40, %v750_v47 }
 0xaff   :  { %v752_v50 = vmul.f32 0.5, %v751_v49 }
 0xb01   :  { %v753_v38 = vsub.f32 1.5, %v752_v50 }
 0xb03   :  { %v754_v51 = vmul.f32 %v1514_v40, %v753_v38 }
 0xb05   :  { %v758_v26 = vsel %vm757_vm9, %v1514_v40, %v754_v51 }
 0xb06   :  { %v760_v52 = vmul.f32 %v758_v26, %v726_v48 }
 0xb08   :  { %v763_v53 = vmul.f32 %v761_v34, %v760_v52 }
 0xb0a   :  { %v766_v54 = vadd.f32 %v764_v39, %v763_v53 }
 0xb0c   :  { %1413 = vmatmul.msk.f32.gmra.mxu0 %vm109_vm4, %v766_v54 }
 0xb69   :  { %v791_v28 = vpop.f32.mrf.mxu0 }
 0xb6a   :  { %v792_v56 = vadd.f32 %v791_v28, %v767_v55 }
 0xb6c   :  { %899 = vrot.lane.b32.xlu2 %v792_v56, %s1608_s21  ;;  %895 = vrot.lane.b32.xlu0 %v792_v56, %s1607_s20 }
 0xb74   :  { %799 = vrot.lane.b32.xlu2 %v792_v56, %s1605_s0 }
 0xb89   :  { %v794_v57 = vpop.f32.mrf.mxu0 }
 0xb8a   :  { %v795_v58 = vadd.f32 %v794_v57, %v767_v55 }
 0xb8c   :  { %801 = vrot.lane.b32.xlu0 %v795_v58, %s1605_s0  ;;  %901 = vrot.lane.b32.xlu1 %v795_v58, %s1608_s21 }
 0xb94   :  { %897 = vrot.lane.b32.xlu1 %v795_v58, %s1607_s20 }
 0xbc6   :  { %v900_v60 = vpop.permute.xlu2 %899 }
 0xbce   :  { %v800_v0 = vpop.permute.xlu2 %799 }
 0xbde   :  { %v896_v59 = vpop.permute.xlu0 %895 }
 0xbfe   :  { %v902_v61 = vpop.permute.xlu1 %901  ;;  %v802_v63 = vpop.permute.xlu0 %801 }
 0xbff   :  { %1414 = vmatpush.xpose.msk.msra.mxu1 %vm263_vm0, %v802_v63  ;;  %1420 = vmatpush.xpose.msk.msrb.mxu0 %vm263_vm0, %v902_v61  ;;  %v696_v63 = vld [vmem:[#allocation2 + $0x158] sm:$0xff] }
 0xc03   :  { %1415 = vmatpush.xpose.msk.msra.mxu1 %vm263_vm0, %v800_v0  ;;  %1421 = vmatpush.xpose.msk.msrb.mxu0 %vm263_vm0, %v900_v60  ;;  %v695_v0 = vld [vmem:[#allocation2 + $0x150] sm:$0xff] }
 0xc06   :  { %1416 = vmatmul.msk.f32.vlgmr.msra.gmra.mxu1 %vm263_vm0, %v792_v56  ;;  %1422 = vmatmul.msk.f32.vlgmr.msrb.gmra.mxu0 %vm263_vm0, %v896_v59  ;;  %v898_v1 = vpop.permute.xlu1 %897 }
 0xc0e   :  { %1417 = vmatmul.msk.f32.gmra.mxu1 %vm263_vm0, %v795_v58  ;;  %1423 = vmatmul.msk.f32.gmra.mxu0 %vm263_vm0, %v898_v1  ;;  %v694_v1 = vld [vmem:[#allocation2 + $0x148] sm:$0xff] }
 0xc83   :  { %v828_v2 = vpop.f32.mrf.mxu1  ;;  %v928_v4 = vpop.f32.mrf.mxu0 }
 0xc84   :  { %v834_v5 = vmul.f32 0.25, %v828_v2  ;;  %v934_v6 = vmul.f32 0.25, %v928_v4  ;;  %v693_v2 = vld [vmem:[#allocation2 + $0x140] sm:$0xff] }
 0xc86   :  { %v936_v8 = vadd.f32 %v934_v6, %v1674_v24  ;;  %v836_v9 = vadd.f32 %v834_v5, %v1674_v24  ;;  %v1467_v24 = vpack.i.bf16 %v792_v56, %v795_v58 }
 0xc88   :  { %v938_v62 = vsel %vm263_vm0, %v936_v8, -inf  ;;  %v838_v44 = vsel %vm263_vm0, %v836_v9, -inf }
 0xc89   :  { %939 = vmax.xlane.f32.xlu1 %v938_v62  ;;  %839 = vmax.xlane.f32.xlu2 %v838_v44  ;;  %v1036_v44 = vperm.slane %v1760_v30, 4 }
 0xc8b   :  { %v831_v10 = vpop.f32.mrf.mxu1  ;;  %v931_v11 = vpop.f32.mrf.mxu0 }
 0xc8c   :  { %v835_v12 = vmul.f32 0.25, %v831_v10  ;;  %v935_v13 = vmul.f32 0.25, %v931_v11 }
 0xc8e   :  { %v937_v48 = vadd.f32 %v935_v13, %v1678_v31  ;;  %v837_v14 = vadd.f32 %v835_v12, %v1678_v31 }
 0xc90   :  { %v941_v15 = vsel %vm263_vm0, %v937_v48, -inf  ;;  %v841_v16 = vsel %vm263_vm0, %v837_v14, -inf }
 0xc91   :  { %942 = vmax.xlane.f32.xlu0 %v941_v15  ;;  %842 = vmax.xlane.f32.xlu1 %v841_v16 }
 0xca5   :  { %1468 = vrot.lane.b32.xlu0 %v1467_v24, %s1609_s22 }
 0xcfc   :  { %v940_v17 = vpop.xlane.xlu1 %939  ;;  %v840_v18 = vpop.xlane.xlu2 %839 }
 0xcfd   :  { %v944_v19 = vsub.f32 %v936_v8, %v940_v17  ;;  %v844_v21 = vsub.f32 %v836_v9, %v840_v18 }
 0xcff   :  { %v946_v20 = vmul.f32 1.442695, %v944_v19  ;;  %v846_v22 = vmul.f32 1.442695, %v844_v21 }
 0xd01   :  { %1515 = vpow2.f32 %v946_v20 }
 0xd02   :  { %1517 = vpow2.f32 %v846_v22 }
 0xd04   :  { %v843_v23 = vpop.xlane.xlu1 %842  ;;  %v943_v25 = vpop.xlane.xlu0 %942 }
 0xd05   :  { %v945_v27 = vsub.f32 %v937_v48, %v943_v25  ;;  %v845_v29 = vsub.f32 %v837_v14, %v843_v23  ;;  %v700_v25 = vld [vmem:[#allocation2 + $0x178] sm:$0xff] }
 0xd06   :  { %1108 = vmatpush.msra.mxu3 %v700_v25 }
 0xd07   :  { %v1516_v31 = vpop.eup %1515  ;;  %v948_v32 = vmul.f32 1.442695, %v945_v27  ;;  %v848_v34 = vmul.f32 1.442695, %v845_v29  ;;  %v699_v27 = vld [vmem:[#allocation2 + $0x170] sm:$0xff]  ;;  %v697_v29 = vld [vmem:[#allocation2 + $0x160] sm:$0xff] }
 0xd08   :  { %v950_v33 = vsel %vm263_vm0, %v1516_v31, 0.0  ;;  %v1518_v35 = vpop.eup %1517  ;;  %1109 = vmatpush.msra.mxu3 %v699_v27  ;;  %v703_v27 = vld [vmem:[#allocation2 + $0x190] sm:$0xff] }
 0xd09   :  { %951 = vadd.xlane.f32.xlu2 %v950_v33  ;;  %1519 = vpow2.f32 %v948_v32  ;;  %v850_v39 = vsel %vm263_vm0, %v1518_v35, 0.0 }
 0xd0a   :  { %1521 = vpow2.f32 %v848_v34 }
 0xd0f   :  { %v1520_v37 = vpop.eup %1519 }
 0xd10   :  { %v953_v41 = vsel %vm263_vm0, %v1520_v37, 0.0  ;;  %v1522_v42 = vpop.eup %1521 }
 0xd11   :  { %851 = vadd.xlane.f32.xlu2 %v850_v39  ;;  %954 = vadd.xlane.f32.xlu1 %v953_v41  ;;  %v853_v46 = vsel %vm263_vm0, %v1522_v42, 0.0 }
 0xd17   :  { %v1469_v43 = vpop.permute.xlu0 %1468 }
 0xd18   :  { %v1470_v45 = vunpack.i.l.bf16 %v1469_v43  ;;  %v1471_v40 = vunpack.i.h.bf16 %v1469_v43 }
 0xd19   :  { %854 = vadd.xlane.f32.xlu2 %v853_v46 }
 0xd1a   :  { %986 = vmatpush.msrb.mxu1 %v1470_v45 }
 0xd1c   :  { %987 = vmatpush.msrb.mxu1 %v1471_v40 }
 0xd2a   :  { %1473 = vrot.lane.b32.xlu1 %v1467_v24, %s1606_s19 }
 0xd7c   :  { %v952_v47 = vpop.xlane.xlu2 %951 }
 0xd7d   :  { %1523 = vrcp.f32 %v952_v47 }
 0xd83   :  { %v1524_v49 = vpop.eup %1523 }
 0xd84   :  { %v958_v50 = vmul.f32 %v1524_v49, %v1516_v31  ;;  %v955_v38 = vpop.xlane.xlu1 %954  ;;  %v852_v52 = vpop.xlane.xlu2 %851  ;;  %v698_v31 = vld [vmem:[#allocation2 + $0x168] sm:$0xff] }
 0xd85   :  { %1525 = vrcp.f32 %v955_v38  ;;  %1110 = vmatpush.msra.mxu3 %v698_v31 }
 0xd86   :  { %1424 = vmatmul.msk.f32.vlgmr.msrb.gmra.mxu1 %vm263_vm0, %v958_v50  ;;  %1527 = vrcp.f32 %v852_v52  ;;  %v1083_v50 = vperm.slane %v1760_v30, 2  ;;  %v1086_v52 = vperm.slane %v1760_v30, 3 }
 0xd87   :  { %1111 = vmatpush.msra.mxu3 %v697_v29 }
 0xd8b   :  { %v1526_v51 = vpop.eup %1525 }
 0xd8c   :  { %v959_v26 = vmul.f32 %v1526_v51, %v1520_v37  ;;  %v855_v53 = vpop.xlane.xlu2 %854  ;;  %v1528_v55 = vpop.eup %1527 }
 0xd8d   :  { %1529 = vrcp.f32 %v855_v53  ;;  %v858_v57 = vmul.f32 %v1528_v55, %v1518_v35 }
 0xd8e   :  { %1425 = vmatmul.msk.f32.gmra.mxu1 %vm263_vm0, %v959_v26 }
 0xd93   :  { %v1530_v58 = vpop.eup %1529 }
 0xd94   :  { %v859_v59 = vmul.f32 %v1530_v58, %v1522_v42 }
 0xd9c   :  { %v1474_v54 = vpop.permute.xlu1 %1473 }
 0xd9d   :  { %v1475_v28 = vunpack.i.l.bf16 %v1474_v54  ;;  %v1476_v56 = vunpack.i.h.bf16 %v1474_v54 }
 0xd9f   :  { %886 = vmatpush.msra.mxu2 %v1475_v28 }
 0xda1   :  { %887 = vmatpush.msra.mxu2 %v1476_v56 }
 0xda2   :  { %1418 = vmatmul.msk.f32.vlgmr.msra.gmra.mxu2 %vm263_vm0, %v858_v57 }
 0xda3   :  { %1023 = vmatpush.msrb.mxu2 %v696_v63  ;;  %v715_v63 = vld [vmem:[#allocation2 + $0x1f0] sm:$0xff] }
 0xda5   :  { %1024 = vmatpush.msrb.mxu2 %v695_v0  ;;  %v1089_v0 = vperm.slane %v1760_v30, 7 }
 0xda7   :  { %1025 = vmatpush.msrb.mxu2 %v694_v1  ;;  %v714_v1 = vld [vmem:[#allocation2 + $0x1e8] sm:$0xff] }
 0xda9   :  { %1026 = vmatpush.msrb.mxu2 %v693_v2 }
 0xdaa   :  { %1419 = vmatmul.msk.f32.gmra.mxu2 %vm263_vm0, %v859_v59 }
 0xe03   :  { %v989_v60 = vpop.f32.mrf.mxu1 }
 0xe04   :  { %997 = vrot.lane.b32.xlu0 %v989_v60, %s1610_s23 }
 0xe0b   :  { %v992_v61 = vpop.f32.mrf.mxu1 }
 0xe0c   :  { %999 = vrot.lane.b32.xlu2 %v992_v61, %s1610_s23  ;;  %v716_v61 = vld [vmem:[#allocation2 + $0x1f8] sm:$0xff] }
 0xe0d   :  { %1199 = vmatpush.msra.mxu0 %v716_v61 }
 0xe0f   :  { %1200 = vmatpush.msra.mxu0 %v715_v63 }
 0xe11   :  { %1201 = vmatpush.msra.mxu0 %v714_v1 }
 0xe25   :  { %v889_v4 = vpop.f32.mrf.mxu2 }
 0xe2d   :  { %v892_v9 = vpop.f32.mrf.mxu2 }
 0xe66   :  { %v1000_v8 = vpop.permute.xlu2 %999 }
 0xe67   :  { %v1004_v62 = vsel %vm263_vm0, %v892_v9, %v1000_v8  ;;  %v711_v9 = vld [vmem:[#allocation2 + $0x1d0] sm:$0xff] }
 0xe76   :  { %v998_v5 = vpop.permute.xlu0 %997 }
 0xe77   :  { %v1003_v6 = vsel %vm263_vm0, %v889_v4, %v998_v5  ;;  %v713_v4 = vld [vmem:[#allocation2 + $0x1e0] sm:$0xff] }
 0xe78   :  { %1426 = vmatmul.msk.f32.vlgmr.msrb.gmra.mxu2 %vm109_vm4, %v1003_v6  ;;  %1202 = vmatpush.msra.mxu0 %v713_v4  ;;  %v712_v6 = vld [vmem:[#allocation2 + $0x1d8] sm:$0xff] }
 0xe7a   :  { %1203 = vmatpush.msra.mxu0 %v712_v6 }
 0xe7c   :  { %1204 = vmatpush.msra.mxu0 %v711_v9 }
 0xe80   :  { %1427 = vmatmul.msk.f32.gmra.mxu2 %vm109_vm4, %v1004_v62 }
 0xefb   :  { %v1028_v10 = vpop.f32.mrf.mxu2 }
 0xefc   :  { %v1034_v11 = vadd.f32 %v1028_v10, %v1744_v3 }
 0xefe   :  { %v1808_v12 = vadd.f32 %v1036_v44, %v1034_v11 }
 0xf00   :  { %v1039_v13 = vsel %vm109_vm4, %v1808_v12, 0.0 }
 0xf01   :  { %1040 = vadd.xlane.f32.xlu0 %v1039_v13  ;;  %v709_v13 = vld [vmem:[#allocation2 + $0x1c0] sm:$0xff] }
 0xf03   :  { %v1031_v48 = vpop.f32.mrf.mxu2 }
 0xf04   :  { %v1035_v14 = vadd.f32 %v1031_v48, %v1749_v7 }
 0xf06   :  { %v1813_v15 = vadd.f32 %v1036_v44, %v1035_v14  ;;  %v710_v44 = vld [vmem:[#allocation2 + $0x1c8] sm:$0xff] }
 0xf07   :  { %1205 = vmatpush.msra.mxu0 %v710_v44 }
 0xf08   :  { %v1042_v16 = vsel %vm109_vm4, %v1813_v15, 0.0 }
 0xf09   :  { %1043 = vadd.xlane.f32.xlu1 %v1042_v16  ;;  %1206 = vmatpush.msra.mxu0 %v709_v13  ;;  %v708_v16 = vld [vmem:[#allocation2 + $0x1b8] sm:$0xff] }
 0xf0b   :  { %1207 = vmatpush.msra.mxu0 %v708_v16 }
 0xf74   :  { %v1041_v24 = vpop.xlane.xlu0 %1040 }
 0xf75   :  { %v1045_v17 = vmul.f32 %v1041_v24, %v1651_v36 }
 0xf77   :  { %v1047_v3 = vsub.f32 %v1808_v12, %v1045_v17  ;;  %v707_v17 = vld [vmem:[#allocation2 + $0x1b0] sm:$0xff] }
 0xf78   :  { %1208 = vmatpush.msra.mxu0 %v707_v17 }
 0xf79   :  { %v1049_v18 = vmul.f32 %v1047_v3, %v1047_v3 }
 0xf7b   :  { %v1051_v19 = vsel %vm109_vm4, %v1049_v18, 0.0  ;;  %v706_v18 = vld [vmem:[#allocation2 + $0x1a8] sm:$0xff] }
 0xf7c   :  { %1052 = vadd.xlane.f32.xlu2 %v1051_v19  ;;  %v1044_v20 = vpop.xlane.xlu1 %1043  ;;  %1209 = vmatpush.msra.mxu0 %v706_v18 }
 0xf7d   :  { %v1046_v21 = vmul.f32 %v1044_v20, %v1651_v36  ;;  %v705_v20 = vld [vmem:[#allocation2 + $0x1a0] sm:$0xff] }
 0xf7e   :  { %1210 = vmatpush.msra.mxu0 %v705_v20 }
 0xf7f   :  { %v1048_v7 = vsub.f32 %v1813_v15, %v1046_v21 }
 0xf81   :  { %v1050_v22 = vmul.f32 %v1048_v7, %v1048_v7 }
 0xf83   :  { %v1054_v23 = vsel %vm109_vm4, %v1050_v22, 0.0 }
 0xf84   :  { %1055 = vadd.xlane.f32.xlu0 %v1054_v23  ;;  %v704_v23 = vld [vmem:[#allocation2 + $0x198] sm:$0xff] }
 0xf85   :  { %1211 = vmatpush.msra.mxu0 %v704_v23 }
 0xf87   :  { %1212 = vmatpush.msra.mxu0 %v703_v27 }
 0xfef   :  { %v1053_v32 = vpop.xlane.xlu2 %1052 }
 0xff0   :  { %v1057_v33 = vmul.f32 %v1053_v32, %v1651_v36 }
 0xff2   :  { %v1059_v34 = vadd.f32 1e-05, %v1057_v33  ;;  %v702_v33 = vld [vmem:[#allocation2 + $0x188] sm:$0xff] }
 0xff3   :  { %1213 = vmatpush.msra.mxu0 %v702_v33 }
 0xff4   :  { %1531 = vrsqrt.f32 %v1059_v34  ;;  %vm1067_vm10 = vweird.f32 %v1059_v34 }
 0xff7   :  { %v1056_v35 = vpop.xlane.xlu0 %1055 }
 0xff8   :  { %v1058_v37 = vmul.f32 %v1056_v35, %v1651_v36 }
 0xffa   :  { %v1532_v39 = vpop.eup %1531  ;;  %v1060_v41 = vadd.f32 1e-05, %v1058_v37 }
 0xffb   :  { %v1062_v42 = vmul.f32 %v1532_v39, %v1059_v34  ;;  %vm1068_vm0 = vweird.f32 %v1532_v39  ;;  %v701_v34 = vld [vmem:[#allocation2 + $0x180] sm:$0xff] }
 0xffc   :  { %1533 = vrsqrt.f32 %v1060_v41  ;;  %vm1069_vm11 = vmor %vm1067_vm10, %vm1068_vm0  ;;  %vm1077_vm13 = vweird.f32 %v1060_v41  ;;  %1214 = vmatpush.msra.mxu0 %v701_v34 }
 0xffd   :  { %v1063_v43 = vmul.f32 %v1532_v39, %v1062_v42 }
 0xfff   :  { %v1064_v45 = vmul.f32 0.5, %v1063_v43 }
0x1001   :  { %v1065_v46 = vsub.f32 1.5, %v1064_v45 }
0x1002   :  { %v1534_v40 = vpop.eup %1533 }
0x1003   :  { %v1066_v47 = vmul.f32 %v1532_v39, %v1065_v46  ;;  %v1072_v49 = vmul.f32 %v1534_v40, %v1060_v41  ;;  %vm1078_vm12 = vweird.f32 %v1534_v40 }
0x1004   :  { %vm1079_vm14 = vmor %vm1077_vm13, %vm1078_vm12 }
0x1005   :  { %v1070_v38 = vsel %vm1069_vm11, %v1532_v39, %v1066_v47  ;;  %v1073_v51 = vmul.f32 %v1534_v40, %v1072_v49 }
0x1006   :  { %v1081_v26 = vmul.f32 %v1070_v38, %v1047_v3 }
0x1007   :  { %v1074_v53 = vmul.f32 0.5, %v1073_v51 }
0x1008   :  { %v1084_v54 = vmul.f32 %v1083_v50, %v1081_v26 }
0x1009   :  { %v1075_v55 = vsub.f32 1.5, %v1074_v53 }
0x100a   :  { %v1087_v28 = vadd.f32 %v1086_v52, %v1084_v54 }
0x100b   :  { %v1076_v56 = vmul.f32 %v1534_v40, %v1075_v55 }
0x100c   :  { %1428 = vmatmul.msk.f32.vlgmr.msra.gmra.mxu3 %vm109_vm4, %v1087_v28 }
0x100d   :  { %v1080_v57 = vsel %vm1079_vm14, %v1534_v40, %v1076_v56 }
0x100e   :  { %v1082_v58 = vmul.f32 %v1080_v57, %v1048_v7 }
0x1010   :  { %v1085_v59 = vmul.f32 %v1083_v50, %v1082_v58 }
0x1012   :  { %v1088_v60 = vadd.f32 %v1086_v52, %v1085_v59 }
0x1014   :  { %1429 = vmatmul.msk.f32.gmra.mxu3 %vm109_vm4, %v1088_v60 }
0x108f   :  { %v1113_v2 = vpop.f32.mrf.mxu3 }
0x1090   :  { %v1830_v5 = vadd.f32 %v1113_v2, %v1089_v0 }
0x1092   :  { %v1833_v8 = vmul.f32 0.70710677, %v1830_v5 }
0x1094   :  { %v1121_v62 = vand.u32 2147483647, %v1833_v8  ;;  %vm1187_vm9 = vcmp.ge.f32.partialorder %v1833_v8, 0.0  ;;  %v1224_v8 = vperm.slane %v1760_v30, 5 }
0x1096   :  { %v1123_v10 = vmul.f32 0.3275911, %v1121_v62  ;;  %v1175_v43 = vsub.f32 0.0, %v1121_v62 }
0x1097   :  { %v1116_v11 = vpop.f32.mrf.mxu3 }
0x1098   :  { %v1125_v48 = vadd.f32 1.0, %v1123_v10  ;;  %v1836_v14 = vadd.f32 %v1116_v11, %v1089_v0  ;;  %v1177_v50 = vmul.f32 %v1175_v43, %v1121_v62 }
0x109a   :  { %1535 = vrcp.f32 %v1125_v48  ;;  %v1839_v24 = vmul.f32 0.70710677, %v1836_v14  ;;  %v1138_v31 = vand.u32 2147483648, %v1125_v48  ;;  %v1136_v32 = vand.u32 2147483647, %v1125_v48 }
0x109b   :  { %vm1132_vm1 = vweird.f32 %v1125_v48  ;;  %v1179_v55 = vmul.f32 1.442695, %v1177_v50  ;;  %v1280_v50 = vld [vmem:[#allocation2 + $0x218] sm:$0xff] }
0x109c   :  { %v1122_v3 = vand.u32 2147483647, %v1839_v24  ;;  %v1139_v37 = vor.u32 1.1754944e-38, %v1138_v31  ;;  %vm1137_vm3 = vcmp.eq.f32.partialorder %v1136_v32, 8.507059e+37  ;;  %vm1188_vm0 = vcmp.ge.f32.partialorder %v1839_v24, 0.0 }
0x109d   :  { %v1194_v31 = vmul.f32 0.5, %v1836_v14 }
0x109e   :  { %v1124_v19 = vmul.f32 0.3275911, %v1122_v3  ;;  %v1176_v57 = vsub.f32 0.0, %v1122_v3 }
0x10a0   :  { %v1536_v21 = vpop.eup %1535  ;;  %v1126_v22 = vadd.f32 1.0, %v1124_v19  ;;  %v1178_v0 = vmul.f32 %v1176_v57, %v1122_v3  ;;  %v1193_v19 = vmul.f32 0.5, %v1830_v5 }
0x10a1   :  { %v1128_v7 = vmul.f32 %v1536_v21, %v1125_v48  ;;  %vm1133_vm15 = vweird.f32 %v1536_v21 }
0x10a2   :  { %1537 = vrcp.f32 %v1126_v22  ;;  %vm1134_vm2 = vmor %vm1132_vm1, %vm1133_vm15  ;;  %v1153_v49 = vand.u32 2147483648, %v1126_v22  ;;  %v1151_v51 = vand.u32 2147483647, %v1126_v22  ;;  %vm1147_vm6 = vweird.f32 %v1126_v22 }
0x10a3   :  { %v1129_v25 = vsub.f32 1.0, %v1128_v7  ;;  %1539 = vpow2.f32 %v1179_v55  ;;  %v1181_v9 = vmul.f32 1.442695, %v1178_v0  ;;  %v1324_v55 = vld [vmem:[#allocation2 + $0x278] sm:$0xff]  ;;  %vm1327_vm1 = vcmask 785408  }
0x10a4   :  { %v1154_v54 = vor.u32 1.1754944e-38, %v1153_v49  ;;  %vm1152_vm8 = vcmp.eq.f32.partialorder %v1151_v51, 8.507059e+37  ;;  %v1281_v49 = vld [vmem:[#allocation2 + $0x220] sm:$0xff]  ;;  %v1278_v51 = vld [vmem:[#allocation2 + $0x208] sm:$0xff] }
0x10a5   :  { %v1130_v29 = vmul.f32 %v1536_v21, %v1129_v25  ;;  %1541 = vpow2.f32 %v1181_v9  ;;  %1301 = vmatpush.msra.mxu1 %v1281_v49 }
0x10a7   :  { %v1131_v35 = vadd.f32 %v1536_v21, %v1130_v29  ;;  %1302 = vmatpush.msra.mxu1 %v1280_v50 }
0x10a8   :  { %v1538_v39 = vpop.eup %1537 }
0x10a9   :  { %v1135_v41 = vsel %vm1134_vm2, %v1536_v21, %v1131_v35  ;;  %v1143_v45 = vmul.f32 %v1538_v39, %v1126_v22  ;;  %vm1148_vm5 = vweird.f32 %v1538_v39  ;;  %v1540_v62 = vpop.eup %1539 }
0x10aa   :  { %v1140_v42 = vsel %vm1137_vm3, %v1139_v37, %v1135_v41  ;;  %vm1149_vm7 = vmor %vm1147_vm6, %vm1148_vm5 }
0x10ab   :  { %v1157_v46 = vmul.f32 1.0614054, %v1140_v42  ;;  %v1144_v40 = vsub.f32 1.0, %v1143_v45  ;;  %v1542_v21 = vpop.eup %1541 }
0x10ad   :  { %v1430_v47 = vadd.f32 -1.4531521, %v1157_v46  ;;  %v1145_v38 = vmul.f32 %v1538_v39, %v1144_v40 }
0x10af   :  { %v1161_v26 = vmul.f32 %v1430_v47, %v1140_v42  ;;  %v1146_v52 = vadd.f32 %v1538_v39, %v1145_v38  ;;  %v1279_v38 = vld [vmem:[#allocation2 + $0x210] sm:$0xff] }
0x10b0   :  { %1303 = vmatpush.msra.mxu1 %v1279_v38 }
0x10b1   :  { %v1163_v53 = vadd.f32 1.4214138, %v1161_v26  ;;  %v1150_v28 = vsel %vm1149_vm7, %v1538_v39, %v1146_v52 }
0x10b2   :  { %v1155_v58 = vsel %vm1152_vm8, %v1154_v54, %v1150_v28  ;;  %1304 = vmatpush.msra.mxu1 %v1278_v51  ;;  %v1325_v54 = vld [vmem:[#allocation2 + $0x280] sm:$0xff]  ;;  %v1323_v28 = vld [vmem:[#allocation2 + $0x270] sm:$0xff] }
0x10b3   :  { %v1165_v56 = vmul.f32 %v1163_v53, %v1140_v42  ;;  %v1158_v59 = vmul.f32 1.0614054, %v1155_v58  ;;  %1338 = vmatpush.msra.mxu2 %v1325_v54 }
0x10b5   :  { %v1432_v60 = vadd.f32 -0.28449672, %v1165_v56  ;;  %v1431_v61 = vadd.f32 -1.4531521, %v1158_v59  ;;  %1339 = vmatpush.msra.mxu2 %v1324_v55 }
0x10b7   :  { %v1169_v63 = vmul.f32 %v1432_v60, %v1140_v42  ;;  %v1162_v1 = vmul.f32 %v1431_v61, %v1155_v58  ;;  %1340 = vmatpush.msra.mxu2 %v1323_v28 }
0x10b9   :  { %v1171_v2 = vadd.f32 0.2548296, %v1169_v63  ;;  %v1164_v4 = vadd.f32 1.4214138, %v1162_v1  ;;  %v1321_v63 = vld [vmem:[#allocation2 + $0x260] sm:$0xff]  ;;  %v1320_v1 = vld [vmem:[#allocation2 + $0x258] sm:$0xff] }
0x10bb   :  { %v1173_v6 = vmul.f32 %v1171_v2, %v1140_v42  ;;  %v1166_v44 = vmul.f32 %v1164_v4, %v1155_v58  ;;  %v1319_v4 = vld [vmem:[#allocation2 + $0x250] sm:$0xff] }
0x10bd   :  { %v1183_v10 = vmul.f32 %v1540_v62, %v1173_v6  ;;  %v1433_v11 = vadd.f32 -0.28449672, %v1166_v44  ;;  %v1227_v6 = vld [vmem:[#allocation2 + $0x200] sm:$0xff]  ;;  %v1318_v62 = vld [vmem:[#allocation2 + $0x248] sm:$0xff] }
0x10bf   :  { %v1185_v13 = vsub.f32 1.0, %v1183_v10  ;;  %v1170_v48 = vmul.f32 %v1433_v11, %v1155_v58  ;;  %v1317_v10 = vld [vmem:[#allocation2 + $0x240] sm:$0xff]  ;;  %v1272_v11 = vperm.slane %v1227_v6, 0 }
0x10c1   :  { %v1189_v16 = vsub.f32 0.0, %v1185_v13  ;;  %v1172_v17 = vadd.f32 0.2548296, %v1170_v48 }
0x10c3   :  { %v1191_v18 = vsel %vm1187_vm9, %v1185_v13, %v1189_v16  ;;  %v1174_v20 = vmul.f32 %v1172_v17, %v1155_v58  ;;  %v1322_v58 = vld [vmem:[#allocation2 + $0x268] sm:$0xff] }
0x10c4   :  { %v1195_v3 = vadd.f32 1.0, %v1191_v18  ;;  %1341 = vmatpush.msra.mxu2 %v1322_v58  ;;  %v1275_v18 = vperm.slane %v1227_v6, 1 }
0x10c5   :  { %v1184_v22 = vmul.f32 %v1542_v21, %v1174_v20 }
0x10c6   :  { %v1197_v7 = vmul.f32 %v1195_v3, %v1193_v19  ;;  %1342 = vmatpush.msra.mxu2 %v1321_v63 }
0x10c7   :  { %v1186_v23 = vsub.f32 1.0, %v1184_v22 }
0x10c8   :  { %1215 = vmatmul.f32.vlgmr.msra.gmra.mxu0 %v1197_v7  ;;  %1343 = vmatpush.msra.mxu2 %v1320_v1 }
0x10c9   :  { %v1190_v25 = vsub.f32 0.0, %v1186_v23 }
0x10ca   :  { %1344 = vmatpush.msra.mxu2 %v1319_v4 }
0x10cb   :  { %v1192_v27 = vsel %vm1188_vm0, %v1186_v23, %v1190_v25 }
0x10cc   :  { %v1196_v29 = vadd.f32 1.0, %v1192_v27  ;;  %1345 = vmatpush.msra.mxu2 %v1318_v62 }
0x10ce   :  { %v1198_v32 = vmul.f32 %v1196_v29, %v1194_v31  ;;  %1346 = vmatpush.msra.mxu2 %v1317_v10  ;;  %v1316_v31 = vld [vmem:[#allocation2 + $0x238] sm:$0xff]  ;;  %v1315_v29 = vld [vmem:[#allocation2 + $0x230] sm:$0xff] }
0x10d0   :  { %1218 = vmatmul.f32.gmra.mxu0 %v1198_v32  ;;  %1347 = vmatpush.msra.mxu2 %v1316_v31  ;;  %v1314_v32 = vld [vmem:[#allocation2 + $0x228] sm:$0xff] }
0x10d2   :  { %1348 = vmatpush.msra.mxu2 %v1315_v29 }
0x10d4   :  { %1349 = vmatpush.msra.mxu2 %v1314_v32 }
0x1145   :  { %v1216_v33 = vpop.f32.mrf.mxu0 }
0x1146   :  { %v1222_v5 = vadd.f32 %v1216_v33, %v1808_v12 }
0x1148   :  { %v1225_v34 = vadd.f32 %v1224_v8, %v1222_v5 }
0x114a   :  { %v1228_v35 = vsel %vm109_vm4, %v1225_v34, 0.0 }
0x114b   :  { %1229 = vadd.xlane.f32.xlu0 %v1228_v35 }
0x114d   :  { %v1219_v37 = vpop.f32.mrf.mxu0 }
0x114e   :  { %v1223_v39 = vadd.f32 %v1219_v37, %v1813_v15 }
0x1150   :  { %v1226_v41 = vadd.f32 %v1224_v8, %v1223_v39  ;;  %v1282_v8 = vperm.slane %v1227_v6, 2 }
0x1152   :  { %v1231_v24 = vsel %vm109_vm4, %v1226_v41, 0.0 }
0x1153   :  { %1232 = vadd.xlane.f32.xlu1 %v1231_v24 }
0x11be   :  { %v1230_v14 = vpop.xlane.xlu0 %1229 }
0x11bf   :  { %v1234_v42 = vmul.f32 %v1230_v14, %v1651_v36 }
0x11c1   :  { %v1236_v43 = vsub.f32 %v1225_v34, %v1234_v42 }
0x11c3   :  { %v1238_v45 = vmul.f32 %v1236_v43, %v1236_v43 }
0x11c5   :  { %v1240_v30 = vsel %vm109_vm4, %v1238_v45, 0.0 }
0x11c6   :  { %1241 = vadd.xlane.f32.xlu0 %v1240_v30  ;;  %v1233_v12 = vpop.xlane.xlu1 %1232 }
0x11c7   :  { %v1235_v46 = vmul.f32 %v1233_v12, %v1651_v36 }
0x11c9   :  { %v1854_v40 = vsub.f32 %v1226_v41, %v1235_v46  ;;  %v1326_v41 = vperm.slane %v1227_v6, 3 }
0x11cb   :  { %v1239_v15 = vmul.f32 %v1854_v40, %v1854_v40 }
0x11cd   :  { %v1243_v47 = vsel %vm109_vm4, %v1239_v15, 0.0 }
0x11ce   :  { %1244 = vadd.xlane.f32.xlu1 %v1243_v47 }
0x1239   :  { %v1242_v26 = vpop.xlane.xlu0 %1241 }
0x123a   :  { %v1246_v52 = vmul.f32 %v1242_v26, %v1651_v36 }
0x123c   :  { %v1248_v53 = vadd.f32 1e-05, %v1246_v52 }
0x123e   :  { %1543 = vrsqrt.f32 %v1248_v53  ;;  %vm1256_vm11 = vweird.f32 %v1248_v53 }
0x1241   :  { %v1245_v56 = vpop.xlane.xlu1 %1244 }
0x1242   :  { %v1247_v57 = vmul.f32 %v1245_v56, %v1651_v36 }
0x1244   :  { %v1544_v59 = vpop.eup %1543  ;;  %v1249_v61 = vadd.f32 1e-05, %v1247_v57 }
0x1245   :  { %v1251_v60 = vmul.f32 %v1544_v59, %v1248_v53  ;;  %vm1257_vm10 = vweird.f32 %v1544_v59 }
0x1246   :  { %1545 = vrsqrt.f32 %v1249_v61  ;;  %vm1258_vm12 = vmor %vm1256_vm11, %vm1257_vm10  ;;  %vm1266_vm14 = vweird.f32 %v1249_v61 }
0x1247   :  { %v1252_v0 = vmul.f32 %v1544_v59, %v1251_v60 }
0x1249   :  { %v1253_v2 = vmul.f32 0.5, %v1252_v0 }
0x124b   :  { %v1254_v9 = vsub.f32 1.5, %v1253_v2 }
0x124c   :  { %v1546_v36 = vpop.eup %1545 }
0x124d   :  { %v1255_v44 = vmul.f32 %v1544_v59, %v1254_v9  ;;  %v1261_v13 = vmul.f32 %v1546_v36, %v1249_v61  ;;  %vm1267_vm13 = vweird.f32 %v1546_v36 }
0x124e   :  { %vm1268_vm15 = vmor %vm1266_vm14, %vm1267_vm13 }
0x124f   :  { %v1259_v48 = vsel %vm1258_vm12, %v1544_v59, %v1255_v44  ;;  %v1262_v17 = vmul.f32 %v1546_v36, %v1261_v13 }
0x1250   :  { %v1270_v16 = vmul.f32 %v1259_v48, %v1236_v43 }
0x1251   :  { %v1263_v3 = vmul.f32 0.5, %v1262_v17 }
0x1252   :  { %v1273_v19 = vmul.f32 %v1272_v11, %v1270_v16 }
0x1253   :  { %v1264_v20 = vsub.f32 1.5, %v1263_v3 }
0x1254   :  { %v1276_v21 = vadd.f32 %v1275_v18, %v1273_v19 }
0x1255   :  { %v1265_v7 = vmul.f32 %v1546_v36, %v1264_v20 }
0x1256   :  { %1434 = vmatmul.msk.f32.vlgmr.msra.gmra.mxu1 %vm109_vm4, %v1276_v21 }
0x1257   :  { %v1269_v22 = vsel %vm1268_vm15, %v1546_v36, %v1265_v7 }
0x1258   :  { %v1271_v23 = vmul.f32 %v1269_v22, %v1854_v40 }
0x125a   :  { %v1274_v25 = vmul.f32 %v1272_v11, %v1271_v23 }
0x125c   :  { %v1277_v27 = vadd.f32 %v1275_v18, %v1274_v25 }
0x125e   :  { %1435 = vmatmul.msk.f32.gmra.mxu1 %vm109_vm4, %v1277_v27 }
0x12d3   :  { %v1306_v33 = vpop.f32.mrf.mxu1 }
0x12d4   :  { %v1307_v5 = vadd.f32 %v1306_v33, %v1282_v8 }
0x12d6   :  { %v1312_v34 = vmax.f32 %v1307_v5, 0.0 }
0x12d8   :  { %1436 = vmatmul.msk.f32.vlgmr.msra.gmra.mxu2 %vm1327_vm1, %v1312_v34 }
0x12db   :  { %v1309_v35 = vpop.f32.mrf.mxu1 }
0x12dc   :  { %v1310_v37 = vadd.f32 %v1309_v35, %v1282_v8 }
0x12de   :  { %v1313_v39 = vmax.f32 %v1310_v37, 0.0 }
0x12e0   :  { %1437 = vmatmul.msk.f32.gmra.mxu2 %vm1327_vm1, %v1313_v39 }
0x135b   :  { %v1351_v24 = vpop.f32.mrf.mxu2 }
0x135c   :  { %v1352_v14 = vadd.f32 %v1351_v24, %v1326_v41 }
0x135e   :  { %1359 = vrot.lane.b32.xlu2 %v1352_v14, %s1611_s24 }
0x1363   :  { %v1354_v42 = vpop.f32.mrf.mxu2 }
0x1364   :  { %v1355_v43 = vadd.f32 %v1354_v42, %v1326_v41 }
0x1366   :  { %1361 = vrot.lane.b32.xlu0 %v1355_v43, %s1611_s24 }
0x13b8   :  { %v1360_v45 = vpop.permute.xlu2 %1359 }
0x13b9   :  { %v1365_v30 = vsel %vm109_vm4, %v1276_v21, %v1360_v45 }
0x13ba   :  { %1367 = vst [vmem:[#allocation5] sm:$0xff] %v1365_v30 }
0x13d8   :  { %v1362_v12 = vpop.permute.xlu0 %1361 }
0x13d9   :  { %v1366_v46 = vsel %vm109_vm4, %v1277_v27, %v1362_v12 }
0x13da   :  { %1368 = vst [vmem:[#allocation5 + $0x8] sm:$0xff] %v1366_v46 }
0x13db   :  { %1381 = dma.vmem_to_hbm [thread:$0]  %s1374_s26, 256, %s1376_s29, [#allocation4], %s1600_s14, %s1600_s14, %s1601_s15  }
0x13dc   :  { %1597 = dma.done.wait [#allocation4], 256  }
0x13dd   :  { %1598 = vsyncadd [#allocation4], 4294967040 }
0x13de   :  { %1386 = vsyncpa [#allocation3], 1 }
0x13df   :  { %1387 = vsyncpa [#allocation4], 1 }

</bundles_post_ra>
